<compile_context>
chip_gen: v7x
topology: tpu7x:2x2x1
jax: 0.10.0
libtpu: 0.0.40
codegen_flags: <defaults>
</compile_context>

<pallas_src>
import functools
import numpy as np

import jax
import jax.numpy as jnp
from jax.experimental import pallas as pl
from jax.experimental.pallas import tpu as pltpu

# ---- stand-ins for C.RPIN.* config constants (synthetic, deterministic) ----
N_EXTRA_SELFD_F = 1
N_EXTRA_RELD_F = 1
N_EXTRA_AFFECTOR_F = 1
N_EXTRA_AGGREGATOR_F = 1


# --------------------------- parameter construction ---------------------------
def _init_linear(key, in_dim, out_dim):
    kw, kb = jax.random.split(key)
    w = jax.random.normal(kw, (in_dim, out_dim), jnp.float32) / np.sqrt(in_dim)
    b = jax.random.normal(kb, (1, out_dim), jnp.float32) * 0.01
    return w, b


def init_internet_params(key, d):
    """Returns (flat_params, counts). flat_params is [W0, b0, W1, b1, ...] in
    order [self_dynamics, rel_dynamics, affector, aggregator]."""
    def mlp(key, in_dims, out_dims):
        layers = []
        for fi, fo in zip(in_dims, out_dims):
            key, sub = jax.random.split(key)
            layers.append(_init_linear(sub, fi, fo))
        return key, layers

    n_self = 1 + N_EXTRA_SELFD_F
    n_rel = 1 + N_EXTRA_RELD_F
    n_aff = 1 + N_EXTRA_AFFECTOR_F
    n_agg = 1 + N_EXTRA_AGGREGATOR_F

    key, self_l = mlp(key, [d] * n_self, [d] * n_self)
    key, rel_l = mlp(key, [2 * d] + [d] * (n_rel - 1), [d] * n_rel)
    key, aff_l = mlp(key, [d] * n_aff, [d] * n_aff)
    key, agg_l = mlp(key, [2 * d] + [d] * (n_agg - 1), [d] * n_agg)

    flat = []
    for layers in (self_l, rel_l, aff_l, agg_l):
        for w, b in layers:
            flat.extend([w, b])
    counts = (n_self, n_rel, n_aff, n_agg)
    return flat, counts


# --------------------- static slot layout for stacked params -------------------
def _slot_layout(counts):
    """Static index maps into the stacked (NW, D, D) weight / (NB, 1, D) bias arrays.
    Rel/agg layer-0 weights (2D -> D) are split into top/bottom D x D halves."""
    n_self, n_rel, n_aff, n_agg = counts
    w, b = {}, {}
    wi = bi = 0
    w["self"] = list(range(wi, wi + n_self)); wi += n_self
    b["self"] = list(range(bi, bi + n_self)); bi += n_self
    w["rel_top"], w["rel_bot"] = wi, wi + 1; wi += 2
    w["rel_rest"] = list(range(wi, wi + n_rel - 1)); wi += n_rel - 1
    b["rel"] = list(range(bi, bi + n_rel)); bi += n_rel
    w["aff"] = list(range(wi, wi + n_aff)); wi += n_aff
    b["aff"] = list(range(bi, bi + n_aff)); bi += n_aff
    w["agg_top"], w["agg_bot"] = wi, wi + 1; wi += 2
    w["agg_rest"] = list(range(wi, wi + n_agg - 1)); wi += n_agg - 1
    b["agg"] = list(range(bi, bi + n_agg)); bi += n_agg
    return w, b


def stack_params(flat_params, counts, d):
    """Pack the 4 MLPs into one weight stack and one bias stack following _slot_layout."""
    mlps, idx = [], 0
    for c in counts:
        layers = []
        for _ in range(c):
            layers.append((flat_params[idx], flat_params[idx + 1]))
            idx += 2
        mlps.append(layers)
    self_l, rel_l, aff_l, agg_l = mlps

    ws, bs = [], []
    for w, b in self_l:
        ws.append(w); bs.append(b)
    w0, b0 = rel_l[0]
    ws.append(w0[:d]); ws.append(w0[d:]); bs.append(b0)
    for w, b in rel_l[1:]:
        ws.append(w); bs.append(b)
    for w, b in aff_l:
        ws.append(w); bs.append(b)
    w0, b0 = agg_l[0]
    ws.append(w0[:d]); ws.append(w0[d:]); bs.append(b0)
    for w, b in agg_l[1:]:
        ws.append(w); bs.append(b)

    w_stack = jnp.stack(ws).astype(jnp.float32)        # (NW, D, D)
    b_stack = jnp.stack(bs).astype(jnp.float32)        # (NB, 1, D)
    return w_stack, b_stack


# ----------------- grid-invariant glue (built once, outside the kernel) --------
def build_selection(g_idx, n_objs, block_batch):
    """Merged block-diagonal, validity-masked one-hot selection matrix S = [S1 | S2]
    so that S @ [x@Wt ; x@Wb] == valid * (x[g1]@Wt + x[g2]@Wb) per pair row."""
    B, P, _ = g_idx.shape
    Bt = block_batch
    G = B // Bt
    g1 = g_idx[..., 0].astype(jnp.int32) % n_objs        # (B, P)
    g2 = g_idx[..., 1].astype(jnp.int32) % n_objs
    valid = g_idx[..., 2].astype(jnp.float32)             # (B, P)
    oh1 = jax.nn.one_hot(g1, n_objs, dtype=jnp.float32) * valid[..., None]   # (B, P, N)
    oh2 = jax.nn.one_hot(g2, n_objs, dtype=jnp.float32) * valid[..., None]
    eye = jnp.eye(Bt, dtype=jnp.float32)

    def blockdiag(oh):
        oh = oh.reshape(G, Bt, P, n_objs)
        bd = jnp.einsum("gbpn,bc->gbpcn", oh, eye)         # (G, Bt, P, Bt, N)
        return bd.reshape(G, Bt * P, Bt * n_objs)

    s1 = blockdiag(oh1)
    s2 = blockdiag(oh2)
    return jnp.concatenate([s1, s2], axis=-1)              # (G, Bt*P, 2*Bt*N)


def build_segment(n_objs, block_batch):
    """Block-diagonal segment-sum matrix: sums the N-1 partner rows of each object
    (pair p belongs to object p // (N-1), matching the module's reshape+sum)."""
    P = n_objs * (n_objs - 1)
    row = np.arange(n_objs)[:, None]
    col = np.arange(P)[None, :]
    seg = (col // (n_objs - 1) == row).astype(np.float32)          # (N, P)
    seg_bd = np.kron(np.eye(block_batch, dtype=np.float32), seg)   # (Bt*N, Bt*P)
    return jnp.asarray(seg_bd)


# --------------------------------- kernel -------------------------------------
def internet_kernel(counts, x_ref, s_ref, seg_ref, w_ref, b_ref, out_ref):
    wl, bl = _slot_layout(counts)

    def layer(h, wi, bi):
        h = jnp.dot(h, w_ref[wi], preferred_element_type=jnp.float32) + b_ref[bi]
        return jnp.maximum(h, 0.0)

    x = x_ref[...]                                        # (Bt*N, D) original features

    # --- self-dynamics MLP ---
    xs = x
    for wi, bi in zip(wl["self"], bl["self"]):
        xs = layer(xs, wi, bi)

    # --- relational branch: rel layer 0 reassociated onto the object slab ---
    # z = [x @ W_rel_top ; x @ W_rel_bot]  (2*Bt*N, D)  -- D x D matmuls on small M
    z_top = jnp.dot(x, w_ref[wl["rel_top"]], preferred_element_type=jnp.float32)
    z_bot = jnp.dot(x, w_ref[wl["rel_bot"]], preferred_element_type=jnp.float32)
    z = jnp.concatenate([z_top, z_bot], axis=0)
    # One merged (validity-masked) selection matmul replaces S1@x, S2@x and the
    # two pair-slab D x D matmuls of the old layout.
    r = jnp.dot(s_ref[0], z, preferred_element_type=jnp.float32) + b_ref[bl["rel"][0]]
    r = jnp.maximum(r, 0.0)
    for wi, bi in zip(wl["rel_rest"], bl["rel"][1:]):
        r = layer(r, wi, bi)
    # Per-object sum over its N-1 partners via the hoisted segment matrix.
    r_sum = jnp.dot(seg_ref[...], r, preferred_element_type=jnp.float32)  # (Bt*N, D)

    pred = xs + r_sum

    # --- affector MLP ---
    a = pred
    for wi, bi in zip(wl["aff"], bl["aff"]):
        a = layer(a, wi, bi)

    # --- aggregator: concat([a, x]) folded into split-weight matmuls ---
    out = (jnp.dot(a, w_ref[wl["agg_top"]], preferred_element_type=jnp.float32)
           + jnp.dot(x, w_ref[wl["agg_bot"]], preferred_element_type=jnp.float32)
           + b_ref[bl["agg"][0]])
    out = jnp.maximum(out, 0.0)
    for wi, bi in zip(wl["agg_rest"], bl["agg"][1:]):
        out = layer(out, wi, bi)

    out_ref[...] = out


# -------------------------------- wrapper --------------------------------------
def make_internet_fn(g_idx, flat_params, counts, d, block_batch=None):
    """Precompute all grid-invariant inputs once (selection / segment matrices,
    stacked params) and return a jitted apply(x) whose only per-call work is the
    single pallas_call."""
    B, P, _ = g_idx.shape
    n_objs = int(round((1 + np.sqrt(1 + 4 * P)) / 2))     # P = N*(N-1)
    assert n_objs * (n_objs - 1) == P

    Bt = B if block_batch is None else block_batch        # default: whole batch, G = 1
    assert B % Bt == 0
    G = B // Bt

    s_bd = build_selection(g_idx, n_objs, Bt)             # (G, Bt*P, 2*Bt*N)
    seg_bd = build_segment(n_objs, Bt)                    # (Bt*N, Bt*P)
    w_stack, b_stack = stack_params(flat_params, counts, d)

    kernel = functools.partial(internet_kernel, counts)

    compiler_params = (pltpu.CompilerParams(dimension_semantics=("parallel",))
                       if G > 1 else None)

    grid_fn = pl.pallas_call(
        kernel,
        out_shape=jax.ShapeDtypeStruct((B * n_objs, d), jnp.float32),
        grid=(G,),
        in_specs=[
            pl.BlockSpec((Bt * n_objs, d), lambda b: (b, 0)),              # x (flattened)
            pl.BlockSpec((1, Bt * P, 2 * Bt * n_objs), lambda b: (b, 0, 0)),  # merged S
            pl.BlockSpec((Bt * n_objs, Bt * P), lambda b: (0, 0)),         # segment-sum
            pl.BlockSpec(w_stack.shape, lambda b: (0, 0, 0)),              # stacked weights
            pl.BlockSpec(b_stack.shape, lambda b: (0, 0, 0)),              # stacked biases
        ],
        out_specs=pl.BlockSpec((Bt * n_objs, d), lambda b: (b, 0)),
        compiler_params=compiler_params,
    )

    @jax.jit
    def apply(x):
        x_flat = x.reshape(B * n_objs, d).astype(jnp.float32)
        out_flat = grid_fn(x_flat, s_bd, seg_bd, w_stack, b_stack)
        return out_flat.reshape(B, n_objs, d)

    return apply


def internet_forward(x, g_idx, flat_params, counts, block_batch=None):
    """One-shot convenience wrapper (rebuilds constants each call)."""
    return make_internet_fn(g_idx, flat_params, counts, x.shape[-1], block_batch)(x)


# --------------------------- pure-JAX reference --------------------------------
def internet_reference(x, g_idx, flat_params, counts):
    B, N, D = x.shape
    mlps, idx = [], 0
    for c in counts:
        layers = []
        for _ in range(c):
            layers.append((flat_params[idx], flat_params[idx + 1]))
            idx += 2
        mlps.append(layers)
    self_l, rel_l, aff_l, agg_l = mlps

    def run_mlp(h, layers):
        for w, b in layers:
            h = jnp.maximum(h @ w + b, 0.0)
        return h

    s = x
    x1 = jnp.tile(x, (1, N - 1, 1))
    i1 = jnp.broadcast_to(g_idx[..., 0:1].astype(jnp.int32), x1.shape)
    y1 = jnp.take_along_axis(x1, i1, axis=1)
    i2 = jnp.broadcast_to(g_idx[..., 1:2].astype(jnp.int32), x1.shape)
    y2 = jnp.take_along_axis(x1, i2, axis=1)
    r = jnp.concatenate([y1, y2], axis=-1).astype(jnp.float32) * g_idx[:, :, 2:3]
    r = r.reshape(B, N, N - 1, r.shape[-1])
    r = run_mlp(r, rel_l)
    r = r.sum(axis=2)
    xx = run_mlp(x, self_l)
    pred = xx + r
    a = run_mlp(pred, aff_l)
    a = jnp.concatenate([a, s], axis=2)
    return run_mlp(a, agg_l)


# ----------------------------------- main ---------------------------------------
if __name__ == "__main__":
    B, N, D = 4, 8, 32        # batch, num_objs, in_feat_dim
    P = N * (N - 1)

    key = jax.random.PRNGKey(0)
    k_x, k_p = jax.random.split(key)

    x = jax.random.normal(k_x, (B, N, D), jnp.float32)

    # g_idx: (B, P, 3) -> [index of object i in x1, index of object j in x1, valid flag]
    ii, jj = [], []
    for i in range(N):
        for j in range(N):
            if j != i:
                ii.append(i)
                jj.append(j)
    ii = np.array(ii, np.float32)
    jj = np.array(jj, np.float32)
    g_list = []
    for b in range(B):
        valid = ((ii + jj + b) % 3 != 0).astype(np.float32)   # batch-dependent 0/1 mask
        g_list.append(np.stack([ii, jj, valid], axis=-1))      # (P, 3)
    g_idx = jnp.asarray(np.stack(g_list, axis=0))              # (B, P, 3)

    flat_params, counts = init_internet_params(k_p, D)

    # Constants (selection / segment matrices, stacked params) are built once here;
    # apply_fn is jitted and runs a single-step pallas_call per invocation.
    apply_fn = make_internet_fn(g_idx, flat_params, counts, D)
    out = jax.block_until_ready(apply_fn(x))

    ref = jax.block_until_ready(internet_reference(x, g_idx, flat_params, counts))

    assert out.shape == (B, N, D)
    np.testing.assert_allclose(np.asarray(out), np.asarray(ref), rtol=2e-3, atol=2e-3)

    print("KERNEL_OK")
</pallas_src>

<mosaic_0001>
module attributes {stable_mosaic.version = 11 : i64} {
  func.func @internet_kernel(%arg0: i32, %arg1: memref<32x32xf32, #tpu.memory_space<vmem>>, %arg2: memref<1x224x64xf32, #tpu.memory_space<vmem>>, %arg3: memref<32x224xf32, #tpu.memory_space<vmem>>, %arg4: memref<10x32x32xf32, #tpu.memory_space<vmem>>, %arg5: memref<8x1x32xf32, #tpu.memory_space<vmem>>, %arg6: memref<32x32xf32, #tpu.memory_space<vmem>>) attributes {dimension_semantics = [#tpu.dimension_semantics<arbitrary>], iteration_bounds = array<i64: 1>, scalar_prefetch = 0 : i64, scratch_operands = 0 : i64, tpu.core_type = #tpu.core_type<tc>, window_params = [{transform_indices = @transform_0, window_bounds = array<i64: 32, 32>}, {transform_indices = @transform_1, window_bounds = array<i64: 1, 224, 64>}, {pipeline_mode = #tpu.pipeline_mode<synchronous>, transform_indices = @transform_2, window_bounds = array<i64: 32, 224>}, {pipeline_mode = #tpu.pipeline_mode<synchronous>, transform_indices = @transform_3, window_bounds = array<i64: 10, 32, 32>}, {pipeline_mode = #tpu.pipeline_mode<synchronous>, transform_indices = @transform_4, window_bounds = array<i64: 8, 1, 32>}, {transform_indices = @transform_5, window_bounds = array<i64: 32, 32>}]} {
    %c0 = arith.constant 0 : index
    %c0_0 = arith.constant 0 : index
    %0 = vector.load %arg1[%c0, %c0_0] : memref<32x32xf32, #tpu.memory_space<vmem>>, vector<32x32xf32>
    %c0_1 = arith.constant 0 : index
    %c0_2 = arith.constant 0 : index
    %c0_3 = arith.constant 0 : index
    %1 = vector.load %arg4[%c0_1, %c0_2, %c0_3] : memref<10x32x32xf32, #tpu.memory_space<vmem>>, vector<1x32x32xf32>
    %2 = vector.shape_cast %1 : vector<1x32x32xf32> to vector<32x32xf32>
    %cst = arith.constant dense<0.000000e+00> : vector<32x32xf32>
    %3 = tpu.matmul %0, %2, %cst {dimension_numbers = #tpu.dot_dimension_numbers<[1], [0], [0], [1], [0, 0, 1, 1], [], []>} : vector<32x32xf32>, vector<32x32xf32>, vector<32x32xf32> -> vector<32x32xf32>
    %c0_4 = arith.constant 0 : index
    %c0_5 = arith.constant 0 : index
    %c0_6 = arith.constant 0 : index
    %4 = vector.load %arg5[%c0_4, %c0_5, %c0_6] : memref<8x1x32xf32, #tpu.memory_space<vmem>>, vector<1x1x32xf32>
    %5 = vector.shape_cast %4 : vector<1x1x32xf32> to vector<1x32xf32>
    %6 = vector.broadcast %5 : vector<1x32xf32> to vector<32x32xf32>
    %7 = arith.addf %3, %6 : vector<32x32xf32>
    %cst_7 = arith.constant 0.000000e+00 : f32
    %8 = vector.broadcast %cst_7 : f32 to vector<32x32xf32>
    %9 = arith.maximumf %7, %8 : vector<32x32xf32>
    %c1 = arith.constant 1 : index
    %c0_8 = arith.constant 0 : index
    %c0_9 = arith.constant 0 : index
    %10 = vector.load %arg4[%c1, %c0_8, %c0_9] : memref<10x32x32xf32, #tpu.memory_space<vmem>>, vector<1x32x32xf32>
    %11 = vector.shape_cast %10 : vector<1x32x32xf32> to vector<32x32xf32>
    %cst_10 = arith.constant dense<0.000000e+00> : vector<32x32xf32>
    %12 = tpu.matmul %9, %11, %cst_10 {dimension_numbers = #tpu.dot_dimension_numbers<[1], [0], [0], [1], [0, 0, 1, 1], [], []>} : vector<32x32xf32>, vector<32x32xf32>, vector<32x32xf32> -> vector<32x32xf32>
    %c1_11 = arith.constant 1 : index
    %c0_12 = arith.constant 0 : index
    %c0_13 = arith.constant 0 : index
    %13 = vector.load %arg5[%c1_11, %c0_12, %c0_13] : memref<8x1x32xf32, #tpu.memory_space<vmem>>, vector<1x1x32xf32>
    %14 = vector.shape_cast %13 : vector<1x1x32xf32> to vector<1x32xf32>
    %15 = vector.broadcast %14 : vector<1x32xf32> to vector<32x32xf32>
    %16 = arith.addf %12, %15 : vector<32x32xf32>
    %cst_14 = arith.constant 0.000000e+00 : f32
    %17 = vector.broadcast %cst_14 : f32 to vector<32x32xf32>
    %18 = arith.maximumf %16, %17 : vector<32x32xf32>
    %c2 = arith.constant 2 : index
    %c0_15 = arith.constant 0 : index
    %c0_16 = arith.constant 0 : index
    %19 = vector.load %arg4[%c2, %c0_15, %c0_16] : memref<10x32x32xf32, #tpu.memory_space<vmem>>, vector<1x32x32xf32>
    %20 = vector.shape_cast %19 : vector<1x32x32xf32> to vector<32x32xf32>
    %cst_17 = arith.constant dense<0.000000e+00> : vector<32x32xf32>
    %21 = tpu.matmul %0, %20, %cst_17 {dimension_numbers = #tpu.dot_dimension_numbers<[1], [0], [0], [1], [0, 0, 1, 1], [], []>} : vector<32x32xf32>, vector<32x32xf32>, vector<32x32xf32> -> vector<32x32xf32>
    %c3 = arith.constant 3 : index
    %c0_18 = arith.constant 0 : index
    %c0_19 = arith.constant 0 : index
    %22 = vector.load %arg4[%c3, %c0_18, %c0_19] : memref<10x32x32xf32, #tpu.memory_space<vmem>>, vector<1x32x32xf32>
    %23 = vector.shape_cast %22 : vector<1x32x32xf32> to vector<32x32xf32>
    %cst_20 = arith.constant dense<0.000000e+00> : vector<32x32xf32>
    %24 = tpu.matmul %0, %23, %cst_20 {dimension_numbers = #tpu.dot_dimension_numbers<[1], [0], [0], [1], [0, 0, 1, 1], [], []>} : vector<32x32xf32>, vector<32x32xf32>, vector<32x32xf32> -> vector<32x32xf32>
    %25 = tpu.concatenate %21, %24 in 0 : vector<32x32xf32>, vector<32x32xf32> -> vector<64x32xf32>
    %c0_21 = arith.constant 0 : index
    %c0_22 = arith.constant 0 : index
    %c0_23 = arith.constant 0 : index
    %26 = vector.load %arg2[%c0_21, %c0_22, %c0_23] : memref<1x224x64xf32, #tpu.memory_space<vmem>>, vector<1x224x64xf32>
    %27 = vector.shape_cast %26 : vector<1x224x64xf32> to vector<224x64xf32>
    %cst_24 = arith.constant dense<0.000000e+00> : vector<224x32xf32>
    %28 = tpu.matmul %27, %25, %cst_24 {dimension_numbers = #tpu.dot_dimension_numbers<[1], [0], [0], [1], [0, 0, 1, 1], [], []>} : vector<224x64xf32>, vector<64x32xf32>, vector<224x32xf32> -> vector<224x32xf32>
    %c2_25 = arith.constant 2 : index
    %c0_26 = arith.constant 0 : index
    %c0_27 = arith.constant 0 : index
    %29 = vector.load %arg5[%c2_25, %c0_26, %c0_27] : memref<8x1x32xf32, #tpu.memory_space<vmem>>, vector<1x1x32xf32>
    %30 = vector.shape_cast %29 : vector<1x1x32xf32> to vector<1x32xf32>
    %31 = vector.broadcast %30 : vector<1x32xf32> to vector<224x32xf32>
    %32 = arith.addf %28, %31 : vector<224x32xf32>
    %cst_28 = arith.constant 0.000000e+00 : f32
    %33 = vector.broadcast %cst_28 : f32 to vector<224x32xf32>
    %34 = arith.maximumf %32, %33 : vector<224x32xf32>
    %c4 = arith.constant 4 : index
    %c0_29 = arith.constant 0 : index
    %c0_30 = arith.constant 0 : index
    %35 = vector.load %arg4[%c4, %c0_29, %c0_30] : memref<10x32x32xf32, #tpu.memory_space<vmem>>, vector<1x32x32xf32>
    %36 = vector.shape_cast %35 : vector<1x32x32xf32> to vector<32x32xf32>
    %cst_31 = arith.constant dense<0.000000e+00> : vector<224x32xf32>
    %37 = tpu.matmul %34, %36, %cst_31 {dimension_numbers = #tpu.dot_dimension_numbers<[1], [0], [0], [1], [0, 0, 1, 1], [], []>} : vector<224x32xf32>, vector<32x32xf32>, vector<224x32xf32> -> vector<224x32xf32>
    %c3_32 = arith.constant 3 : index
    %c0_33 = arith.constant 0 : index
    %c0_34 = arith.constant 0 : index
    %38 = vector.load %arg5[%c3_32, %c0_33, %c0_34] : memref<8x1x32xf32, #tpu.memory_space<vmem>>, vector<1x1x32xf32>
    %39 = vector.shape_cast %38 : vector<1x1x32xf32> to vector<1x32xf32>
    %40 = vector.broadcast %39 : vector<1x32xf32> to vector<224x32xf32>
    %41 = arith.addf %37, %40 : vector<224x32xf32>
    %cst_35 = arith.constant 0.000000e+00 : f32
    %42 = vector.broadcast %cst_35 : f32 to vector<224x32xf32>
    %43 = arith.maximumf %41, %42 : vector<224x32xf32>
    %c0_36 = arith.constant 0 : index
    %c0_37 = arith.constant 0 : index
    %44 = vector.load %arg3[%c0_36, %c0_37] : memref<32x224xf32, #tpu.memory_space<vmem>>, vector<32x224xf32>
    %cst_38 = arith.constant dense<0.000000e+00> : vector<32x32xf32>
    %45 = tpu.matmul %44, %43, %cst_38 {dimension_numbers = #tpu.dot_dimension_numbers<[1], [0], [0], [1], [0, 0, 1, 1], [], []>} : vector<32x224xf32>, vector<224x32xf32>, vector<32x32xf32> -> vector<32x32xf32>
    %46 = arith.addf %18, %45 : vector<32x32xf32>
    %c5 = arith.constant 5 : index
    %c0_39 = arith.constant 0 : index
    %c0_40 = arith.constant 0 : index
    %47 = vector.load %arg4[%c5, %c0_39, %c0_40] : memref<10x32x32xf32, #tpu.memory_space<vmem>>, vector<1x32x32xf32>
    %48 = vector.shape_cast %47 : vector<1x32x32xf32> to vector<32x32xf32>
    %cst_41 = arith.constant dense<0.000000e+00> : vector<32x32xf32>
    %49 = tpu.matmul %46, %48, %cst_41 {dimension_numbers = #tpu.dot_dimension_numbers<[1], [0], [0], [1], [0, 0, 1, 1], [], []>} : vector<32x32xf32>, vector<32x32xf32>, vector<32x32xf32> -> vector<32x32xf32>
    %c4_42 = arith.constant 4 : index
    %c0_43 = arith.constant 0 : index
    %c0_44 = arith.constant 0 : index
    %50 = vector.load %arg5[%c4_42, %c0_43, %c0_44] : memref<8x1x32xf32, #tpu.memory_space<vmem>>, vector<1x1x32xf32>
    %51 = vector.shape_cast %50 : vector<1x1x32xf32> to vector<1x32xf32>
    %52 = vector.broadcast %51 : vector<1x32xf32> to vector<32x32xf32>
    %53 = arith.addf %49, %52 : vector<32x32xf32>
    %cst_45 = arith.constant 0.000000e+00 : f32
    %54 = vector.broadcast %cst_45 : f32 to vector<32x32xf32>
    %55 = arith.maximumf %53, %54 : vector<32x32xf32>
    %c6 = arith.constant 6 : index
    %c0_46 = arith.constant 0 : index
    %c0_47 = arith.constant 0 : index
    %56 = vector.load %arg4[%c6, %c0_46, %c0_47] : memref<10x32x32xf32, #tpu.memory_space<vmem>>, vector<1x32x32xf32>
    %57 = vector.shape_cast %56 : vector<1x32x32xf32> to vector<32x32xf32>
    %cst_48 = arith.constant dense<0.000000e+00> : vector<32x32xf32>
    %58 = tpu.matmul %55, %57, %cst_48 {dimension_numbers = #tpu.dot_dimension_numbers<[1], [0], [0], [1], [0, 0, 1, 1], [], []>} : vector<32x32xf32>, vector<32x32xf32>, vector<32x32xf32> -> vector<32x32xf32>
    %c5_49 = arith.constant 5 : index
    %c0_50 = arith.constant 0 : index
    %c0_51 = arith.constant 0 : index
    %59 = vector.load %arg5[%c5_49, %c0_50, %c0_51] : memref<8x1x32xf32, #tpu.memory_space<vmem>>, vector<1x1x32xf32>
    %60 = vector.shape_cast %59 : vector<1x1x32xf32> to vector<1x32xf32>
    %61 = vector.broadcast %60 : vector<1x32xf32> to vector<32x32xf32>
    %62 = arith.addf %58, %61 : vector<32x32xf32>
    %cst_52 = arith.constant 0.000000e+00 : f32
    %63 = vector.broadcast %cst_52 : f32 to vector<32x32xf32>
    %64 = arith.maximumf %62, %63 : vector<32x32xf32>
    %c7 = arith.constant 7 : index
    %c0_53 = arith.constant 0 : index
    %c0_54 = arith.constant 0 : index
    %65 = vector.load %arg4[%c7, %c0_53, %c0_54] : memref<10x32x32xf32, #tpu.memory_space<vmem>>, vector<1x32x32xf32>
    %66 = vector.shape_cast %65 : vector<1x32x32xf32> to vector<32x32xf32>
    %cst_55 = arith.constant dense<0.000000e+00> : vector<32x32xf32>
    %67 = tpu.matmul %64, %66, %cst_55 {dimension_numbers = #tpu.dot_dimension_numbers<[1], [0], [0], [1], [0, 0, 1, 1], [], []>} : vector<32x32xf32>, vector<32x32xf32>, vector<32x32xf32> -> vector<32x32xf32>
    %c8 = arith.constant 8 : index
    %c0_56 = arith.constant 0 : index
    %c0_57 = arith.constant 0 : index
    %68 = vector.load %arg4[%c8, %c0_56, %c0_57] : memref<10x32x32xf32, #tpu.memory_space<vmem>>, vector<1x32x32xf32>
    %69 = vector.shape_cast %68 : vector<1x32x32xf32> to vector<32x32xf32>
    %cst_58 = arith.constant dense<0.000000e+00> : vector<32x32xf32>
    %70 = tpu.matmul %0, %69, %cst_58 {dimension_numbers = #tpu.dot_dimension_numbers<[1], [0], [0], [1], [0, 0, 1, 1], [], []>} : vector<32x32xf32>, vector<32x32xf32>, vector<32x32xf32> -> vector<32x32xf32>
    %71 = arith.addf %67, %70 : vector<32x32xf32>
    %c6_59 = arith.constant 6 : index
    %c0_60 = arith.constant 0 : index
    %c0_61 = arith.constant 0 : index
    %72 = vector.load %arg5[%c6_59, %c0_60, %c0_61] : memref<8x1x32xf32, #tpu.memory_space<vmem>>, vector<1x1x32xf32>
    %73 = vector.shape_cast %72 : vector<1x1x32xf32> to vector<1x32xf32>
    %74 = vector.broadcast %73 : vector<1x32xf32> to vector<32x32xf32>
    %75 = arith.addf %71, %74 : vector<32x32xf32>
    %cst_62 = arith.constant 0.000000e+00 : f32
    %76 = vector.broadcast %cst_62 : f32 to vector<32x32xf32>
    %77 = arith.maximumf %75, %76 : vector<32x32xf32>
    %c9 = arith.constant 9 : index
    %c0_63 = arith.constant 0 : index
    %c0_64 = arith.constant 0 : index
    %78 = vector.load %arg4[%c9, %c0_63, %c0_64] : memref<10x32x32xf32, #tpu.memory_space<vmem>>, vector<1x32x32xf32>
    %79 = vector.shape_cast %78 : vector<1x32x32xf32> to vector<32x32xf32>
    %cst_65 = arith.constant dense<0.000000e+00> : vector<32x32xf32>
    %80 = tpu.matmul %77, %79, %cst_65 {dimension_numbers = #tpu.dot_dimension_numbers<[1], [0], [0], [1], [0, 0, 1, 1], [], []>} : vector<32x32xf32>, vector<32x32xf32>, vector<32x32xf32> -> vector<32x32xf32>
    %c7_66 = arith.constant 7 : index
    %c0_67 = arith.constant 0 : index
    %c0_68 = arith.constant 0 : index
    %81 = vector.load %arg5[%c7_66, %c0_67, %c0_68] : memref<8x1x32xf32, #tpu.memory_space<vmem>>, vector<1x1x32xf32>
    %82 = vector.shape_cast %81 : vector<1x1x32xf32> to vector<1x32xf32>
    %83 = vector.broadcast %82 : vector<1x32xf32> to vector<32x32xf32>
    %84 = arith.addf %80, %83 : vector<32x32xf32>
    %cst_69 = arith.constant 0.000000e+00 : f32
    %85 = vector.broadcast %cst_69 : f32 to vector<32x32xf32>
    %86 = arith.maximumf %84, %85 : vector<32x32xf32>
    %c0_70 = arith.constant 0 : index
    %c0_71 = arith.constant 0 : index
    %87 = vector.load %arg6[%c0_70, %c0_71] : memref<32x32xf32, #tpu.memory_space<vmem>>, vector<32x32xf32>
    tpu.vector_store %arg6[%c0_70, %c0_71], %86 {strides = array<i32>} : memref<32x32xf32, #tpu.memory_space<vmem>>, vector<32x32xf32>,
    return
  }
  func.func @transform_0(%arg0: i32) -> (i32, i32) {
    %c0_i32 = arith.constant 0 : i32
    %c0_i32_0 = arith.constant 0 : i32
    return %arg0, %c0_i32 : i32, i32
  }
  func.func @transform_1(%arg0: i32) -> (i32, i32, i32) {
    %c0_i32 = arith.constant 0 : i32
    %c0_i32_0 = arith.constant 0 : i32
    %c0_i32_1 = arith.constant 0 : i32
    return %arg0, %c0_i32, %c0_i32_0 : i32, i32, i32
  }
  func.func @transform_2(%arg0: i32) -> (i32, i32) {
    %c0_i32 = arith.constant 0 : i32
    %c0_i32_0 = arith.constant 0 : i32
    %c0_i32_1 = arith.constant 0 : i32
    return %c0_i32, %c0_i32_0 : i32, i32
  }
  func.func @transform_3(%arg0: i32) -> (i32, i32, i32) {
    %c0_i32 = arith.constant 0 : i32
    %c0_i32_0 = arith.constant 0 : i32
    %c0_i32_1 = arith.constant 0 : i32
    %c0_i32_2 = arith.constant 0 : i32
    return %c0_i32, %c0_i32_0, %c0_i32_1 : i32, i32, i32
  }
  func.func @transform_4(%arg0: i32) -> (i32, i32, i32) {
    %c0_i32 = arith.constant 0 : i32
    %c0_i32_0 = arith.constant 0 : i32
    %c0_i32_1 = arith.constant 0 : i32
    %c0_i32_2 = arith.constant 0 : i32
    return %c0_i32, %c0_i32_0, %c0_i32_1 : i32, i32, i32
  }
  func.func @transform_5(%arg0: i32) -> (i32, i32) {
    %c0_i32 = arith.constant 0 : i32
    %c0_i32_0 = arith.constant 0 : i32
    return %arg0, %c0_i32 : i32, i32
  }
}

</mosaic_0001>

<bundles_post_ra>
// kernel: apply.1
= control target key start
LH: loop header
LB: loop body
LE: loop exit
PB: predicated region body
PF: predicated region fallthrough
CT: control target
= control target key end

     0   :  { %10 = vsyncpa [#allocation3], 0  ;;  %s2962_s0 = inlined_call_operand.hbm [shape: f32[32,32], index: 0, kind: input, shape index: {}]   ;;  %s2963_s1 = inlined_call_operand.hbm [shape: f32[1,224,64], index: 1, kind: input, shape index: {}]   ;;  %s2964_s2 = inlined_call_operand.hbm [shape: f32[32,224], index: 2, kind: input, shape index: {}]   ;;  %s2965_s3 = inlined_call_operand.hbm [shape: f32[10,32,32], index: 3, kind: input, shape index: {}]   ;;  %s2966_s4 = inlined_call_operand.vmem [shape: f32[8,1,32], index: 4, kind: input, shape index: {}]   ;;  %s2967_s5 = inlined_call_operand.hbm [shape: f32[32,32], index: 5, kind: output, shape index: {}]  }
   0x1   :  { %11 = vsyncpa [#allocation6], 0 }
   0x2   :  { %12 = vsyncpa [#allocation9], 0 }
   0x3   :  { %13 = vsyncpa [#allocation4], 0  ;;  %s2609_s18 = smov [#allocation5]   ;;  %s2610_s20 = smov [#allocation2]  }
   0x4   :  { %s31_s19 = sshll.u32 %s2609_s18, 4  ;;  %s19_s21 = sshll.u32 %s2610_s20, 4  ;;  %s32_s19 = int_to_ptr.vmem [resolvable:$true] %s31_s19  ;;  %s2649_s21 = int_to_ptr.vmem [resolvable:$true] %s19_s21 }
   0x5   :  { %s2491_s24 = scalar_lea.hbm %s2963_s1, 3584 }
   0x6   :  { %p2492_p0 = scmp.ne.s32.totalorder %s2963_s1, %s2491_s24  ;;  %p2495_p1 = scmp.lt.u32.totalorder %s2491_s24, %s2963_s1 }
   0x8   :  { %p2497_p2 = pnand %p2495_p1, %p2492_p0 }
   0xa   :  { %2500 = shalt.err (!%p2497_p2)
}
   0xb   :  { %s2501_s29 = scalar_lea.vmem %s32_s19, 3584  ;;  %p2506_p4 = scmp.lt.s32.totalorder %s32_s19, %s32_s19 }
   0xc   :  { %p2502_p3 = scmp.ne.s32.totalorder %s32_s19, %s2501_s29  ;;  %p2507_p5 = scmp.lt.s32.totalorder %s2501_s29, %s2501_s29 }
   0xe   :  { %p2508_p6 = por %p2507_p5, %p2506_p4 }
  0x10   :  { %p2509_p7 = pnand %p2508_p6, %p2502_p3 }
  0x12   :  { %2512 = shalt.err (!%p2509_p7)
}
  0x13   :  { %s2611_s30 = smov 128   ;;  %s2612_s6 = smov 8  }
  0x14   :  { %37 = dma.hbm_to_vmem [thread:$0]  %s2963_s1, 3584, %s32_s19, [#allocation6], %s2611_s30, %s2611_s30, %s2612_s6  }
  0x15   :  { %s2513_s11 = scalar_lea.hbm %s2962_s0, 512 }
  0x16   :  { %p2514_p8 = scmp.ne.s32.totalorder %s2962_s0, %s2513_s11  ;;  %p2517_p9 = scmp.lt.u32.totalorder %s2513_s11, %s2962_s0 }
  0x18   :  { %p2519_p10 = pnand %p2517_p9, %p2514_p8 }
  0x1a   :  { %2522 = shalt.err (!%p2519_p10)
}
  0x1b   :  { %s2523_s16 = scalar_lea.vmem %s2649_s21, 512  ;;  %p2528_p12 = scmp.lt.s32.totalorder %s2649_s21, %s2649_s21 }
  0x1c   :  { %p2524_p11 = scmp.ne.s32.totalorder %s2649_s21, %s2523_s16  ;;  %p2529_p13 = scmp.lt.s32.totalorder %s2523_s16, %s2523_s16 }
  0x1e   :  { %p2530_p0 = por %p2529_p13, %p2528_p12 }
  0x20   :  { %p2531_p1 = pnand %p2530_p0, %p2524_p11 }
  0x22   :  { %2534 = shalt.err (!%p2531_p1)
}
  0x23   :  { %25 = dma.hbm_to_vmem [thread:$0]  %s2962_s0, 512, %s2649_s21, [#allocation3], %s2611_s30, %s2611_s30, %s2612_s6  }
  0x24   :  { %s2613_s18 = smov [#allocation7]   ;;  %s2535_s23 = scalar_lea.hbm %s2964_s2, 1024 }
  0x25   :  { %s43_s19 = sshll.u32 %s2613_s18, 4  ;;  %p2536_p2 = scmp.ne.s32.totalorder %s2964_s2, %s2535_s23  ;;  %s44_s19 = int_to_ptr.vmem [resolvable:$true] %s43_s19 }
  0x26   :  { %p2539_p3 = scmp.lt.u32.totalorder %s2535_s23, %s2964_s2 }
  0x28   :  { %p2541_p4 = pnand %p2539_p3, %p2536_p2 }
  0x2a   :  { %2544 = shalt.err (!%p2541_p4)
}
  0x2b   :  { %s2545_s28 = scalar_lea.vmem %s44_s19, 1024  ;;  %p2550_p6 = scmp.lt.s32.totalorder %s44_s19, %s44_s19 }
  0x2c   :  { %p2546_p5 = scmp.ne.s32.totalorder %s44_s19, %s2545_s28  ;;  %p2551_p7 = scmp.lt.s32.totalorder %s2545_s28, %s2545_s28 }
  0x2e   :  { %p2552_p8 = por %p2551_p7, %p2550_p6 }
  0x30   :  { %p2553_p9 = pnand %p2552_p8, %p2546_p5 }
  0x32   :  { %2556 = shalt.err (!%p2553_p9)
}
  0x33   :  { %s2614_s0 = smov 256   ;;  %s2615_s21 = smov 16  }
  0x34   :  { %49 = dma.hbm_to_vmem [thread:$0]  %s2964_s2, 1024, %s44_s19, [#allocation6], %s2614_s0, %s2614_s0, %s2615_s21  }
  0x35   :  { %s2616_s8 = smov [#allocation8]   ;;  %s2557_s12 = scalar_lea.hbm %s2965_s3, 5120 }
  0x36   :  { %s55_s9 = sshll.u32 %s2616_s8, 4  ;;  %p2558_p10 = scmp.ne.s32.totalorder %s2965_s3, %s2557_s12  ;;  %s56_s9 = int_to_ptr.vmem [resolvable:$true] %s55_s9 }
  0x37   :  { %p2561_p11 = scmp.lt.u32.totalorder %s2557_s12, %s2965_s3 }
  0x39   :  { %p2563_p12 = pnand %p2561_p11, %p2558_p10 }
  0x3b   :  { %2566 = shalt.err (!%p2563_p12)
}
  0x3c   :  { %s2567_s1 = scalar_lea.vmem %s56_s9, 5120  ;;  %p2572_p0 = scmp.lt.s32.totalorder %s56_s9, %s56_s9 }
  0x3d   :  { %p2568_p13 = scmp.ne.s32.totalorder %s56_s9, %s2567_s1  ;;  %p2573_p1 = scmp.lt.s32.totalorder %s2567_s1, %s2567_s1 }
  0x3f   :  { %p2574_p2 = por %p2573_p1, %p2572_p0 }
  0x41   :  { %p2575_p3 = pnand %p2574_p2, %p2568_p13 }
  0x43   :  { %2578 = shalt.err (!%p2575_p3)
}
  0x44   :  { %61 = dma.hbm_to_vmem [thread:$0]  %s2965_s3, 5120, %s56_s9, [#allocation9], %s2611_s30, %s2611_s30, %s2612_s6  }
  0x45   :  { %2601 = dma.done.wait [#allocation3], 512  }
  0x46   :  { %2602 = vsyncadd [#allocation3], 4294966784 }
  0x47   :  { %2603 = dma.done.wait [#allocation6], 4608  }
  0x48   :  { %2604 = vsyncadd [#allocation6], 4294962688 }
  0x49   :  { %2605 = dma.done.wait [#allocation9], 5120  }
  0x4a   :  { %2606 = vsyncadd [#allocation9], 4294962176  ;;  %vm91_vm0 = vcmask 261120   ;;  %v80_v0 = vld [vmem:[#allocation8] sm:$0xff]  ;;  %v81_v1 = vld [vmem:[#allocation8 + $0x8] sm:$0xff]  ;;  %vm523_vm1 = vcmask 523264  }
  0x4b   :  { %v82_v2 = vld [vmem:[#allocation8 + $0x10] sm:$0xff]  ;;  %v2339_v3 = vpack.c.bf16 %v81_v1, %v80_v0  ;;  %v83_v4 = vld [vmem:[#allocation8 + $0x18] sm:$0xff]  ;;  %v2713_v5 = vld [vmem:[#allocation2] sm:$0xff]  ;;  %vm1179_vm2 = vcmask 785408   ;;  %s2618_s9 = smov [#allocation10]  }
  0x4c   :  { %v2343_v6 = vpack.c.bf16 %v83_v4, %v82_v2  ;;  %2113 = vmatprep.mubr.msk.f32.mxu0 %vm91_vm0, %v2713_v5  ;;  %v308_v7 = vld [vmem:[#allocation8 + $0x40] sm:$0xff]  ;;  %v309_v8 = vld [vmem:[#allocation8 + $0x48] sm:$0xff]  ;;  %v2719_v14 = vld [vmem:[#allocation2 + $0x10] sm:$0xff]  ;;  %s1840_s10 = sshll.u32 %s2618_s9, 4  ;;  %s1841_s10 = int_to_ptr.vmem [resolvable:$true] %s1840_s10 }
  0x4d   :  { %2340 = vmatprep.subr.bf16.mxu0 %v2339_v3  ;;  %v194_v9 = vld [vmem:[#allocation8 + $0x20] sm:$0xff]  ;;  %v195_v10 = vld [vmem:[#allocation8 + $0x28] sm:$0xff]  ;;  %v2355_v12 = vpack.c.bf16 %v309_v8, %v308_v7  ;;  %v2725_v15 = vld [vmem:[#allocation2 + $0x18] sm:$0xff]  ;;  %p2584_p5 = scmp.lt.s32.totalorder %s1841_s10, %s1841_s10 }
  0x4e   :  { %2342 = vmatpush3.bf16.msra.mxu0 %v2339_v3  ;;  %v2347_v11 = vpack.c.bf16 %v195_v10, %v194_v9  ;;  %v2717_v13 = vld [vmem:[#allocation2 + $0x8] sm:$0xff]  ;;  %v310_v16 = vld [vmem:[#allocation8 + $0x50] sm:$0xff]  ;;  %v311_v17 = vld [vmem:[#allocation8 + $0x58] sm:$0xff] }
  0x4f   :  { %2344 = vmatprep.subr.bf16.mxu0 %v2343_v6  ;;  %v2359_v18 = vpack.c.bf16 %v311_v17, %v310_v16  ;;  %v196_v19 = vld [vmem:[#allocation8 + $0x30] sm:$0xff]  ;;  %v197_v20 = vld [vmem:[#allocation8 + $0x38] sm:$0xff]  ;;  %v398_v22 = vld [vmem:[#allocation8 + $0x60] sm:$0xff] }
  0x50   :  { %2348 = vmatprep.subr.bf16.mxu1 %v2347_v11  ;;  %v2351_v21 = vpack.c.bf16 %v197_v20, %v196_v19  ;;  %v399_v23 = vld [vmem:[#allocation8 + $0x68] sm:$0xff]  ;;  %v1854_v25 = vld [vmem:[%s2966_s4] ss:$0 sm:$0xff]  ;;  %v400_v30 = vld [vmem:[#allocation8 + $0x70] sm:$0xff] }
  0x51   :  { %2350 = vmatpush3.bf16.msra.mxu1 %v2347_v11  ;;  %v2363_v24 = vpack.c.bf16 %v399_v23, %v398_v22  ;;  %v401_v31 = vld [vmem:[#allocation8 + $0x78] sm:$0xff]  ;;  %v487_v47 = vld [vmem:[#allocation5] sm:$0xff]  ;;  %v843_v49 = vld [vmem:[#allocation8 + $0x88] sm:$0xff] }
  0x52   :  { %2346 = vmatpush3.bf16.msra.mxu0 %v2343_v6  ;;  %2352 = vmatprep.subr.bf16.mxu1 %v2351_v21  ;;  %v2367_v37 = vpack.c.bf16 %v401_v31, %v400_v30  ;;  %v842_v48 = vld [vmem:[#allocation8 + $0x80] sm:$0xff]  ;;  %v488_v61 = vld [vmem:[#allocation5 + $0x8] sm:$0xff]  ;;  %v489_v62 = vld [vmem:[#allocation5 + $0x10] sm:$0xff] }
  0x53   :  { %2356 = vmatprep.subr.bf16.mxu0 %v2355_v12  ;;  %v2387_v50 = vpack.c.bf16 %v843_v49, %v842_v48  ;;  %v490_v63 = vld [vmem:[#allocation5 + $0x18] sm:$0xff]  ;;  %v491_v0 = vld [vmem:[#allocation5 + $0x20] sm:$0xff]  ;;  %v492_v1 = vld [vmem:[#allocation5 + $0x28] sm:$0xff] }
  0x54   :  { %v493_v2 = vld [vmem:[#allocation5 + $0x30] sm:$0xff]  ;;  %v494_v3 = vld [vmem:[#allocation5 + $0x38] sm:$0xff]  ;;  %v495_v4 = vld [vmem:[#allocation5 + $0x40] sm:$0xff] }
  0x55   :  { %2114 = vmatmul.mubr.msk.f32.vlgmr.msra.gmra.mrb[0].mxu0 %vm91_vm0, %v2717_v13  ;;  %2354 = vmatpush3.bf16.msra.mxu1 %v2351_v21  ;;  %v496_v6 = vld [vmem:[#allocation5 + $0x48] sm:$0xff]  ;;  %v497_v7 = vld [vmem:[#allocation5 + $0x50] sm:$0xff]  ;;  %v498_v8 = vld [vmem:[#allocation5 + $0x58] sm:$0xff] }
  0x56   :  { %2116 = vmatprep.mubr.msk.f32.mxu0 %vm91_vm0, %v2719_v14  ;;  %2358 = vmatpush3.bf16.msra.mxu0 %v2355_v12  ;;  %v499_v9 = vld [vmem:[#allocation5 + $0x60] sm:$0xff]  ;;  %v500_v10 = vld [vmem:[#allocation5 + $0x68] sm:$0xff]  ;;  %v501_v11 = vld [vmem:[#allocation5 + $0x70] sm:$0xff] }
  0x57   :  { %2360 = vmatprep.subr.bf16.mxu0 %v2359_v18  ;;  %2364 = vmatprep.subr.bf16.mxu1 %v2363_v24  ;;  %v502_v12 = vld [vmem:[#allocation5 + $0x78] sm:$0xff]  ;;  %v503_v16 = vld [vmem:[#allocation5 + $0x80] sm:$0xff]  ;;  %v504_v17 = vld [vmem:[#allocation5 + $0x88] sm:$0xff] }
  0x58   :  { %v506_v19 = vld [vmem:[#allocation5 + $0x98] sm:$0xff]  ;;  %v507_v20 = vld [vmem:[#allocation5 + $0xa0] sm:$0xff]  ;;  %v508_v21 = vld [vmem:[#allocation5 + $0xa8] sm:$0xff] }
  0x59   :  { %2117 = vmatmul.mubr.msk.f32.gmra.mrb[2].mxu0 %vm91_vm0, %v2725_v15  ;;  %v509_v22 = vld [vmem:[#allocation5 + $0xb0] sm:$0xff]  ;;  %v510_v23 = vld [vmem:[#allocation5 + $0xb8] sm:$0xff]  ;;  %v2791_v31 = vld [vmem:[%s2966_s4 + $0x2] ss:$0 sm:$0xff] }
  0x5a   :  { %2141 = vmatprep.mubr.msk.f32.mxu0 %vm91_vm0, %v2713_v5  ;;  %2362 = vmatpush3.bf16.msra.mxu0 %v2359_v18  ;;  %v505_v18 = vld [vmem:[#allocation5 + $0x90] sm:$0xff] }
  0x5d   :  { %2142 = vmatmul.mubr.msk.f32.vlgmr.msra.gmra.mrb[4].mxu0 %vm91_vm0, %v2717_v13 }
  0x5e   :  { %2144 = vmatprep.mubr.msk.f32.mxu0 %vm91_vm0, %v2719_v14 }
  0x61   :  { %2145 = vmatmul.mubr.msk.f32.gmra.mrb[6].mxu0 %vm91_vm0, %v2725_v15 }
  0x62   :  { %2177 = vmatprep.mubr.msk.f32.mxu0 %vm523_vm1, %v487_v47 }
 0x128   :  { %v2115_v26 = vpop.f32.mrb[0].mxu0 }
 0x129   :  { %v176_v27 = vadd.f32 %v2115_v26, %v1854_v25  ;;  %v170_v28 = vpop.f32.mrb[1].mxu0  ;;  %v513_v26 = vld [vmem:[#allocation5 + $0xd0] sm:$0xff] }
 0x12a   :  { %v171_v29 = vadd.f32 %v1854_v25, %v170_v28  ;;  %v844_v28 = vld [vmem:[#allocation8 + $0x90] sm:$0xff] }
 0x12b   :  { %v190_v34 = vmax.f32 %v176_v27, 0.0  ;;  %v514_v27 = vld [vmem:[#allocation5 + $0xd8] sm:$0xff] }
 0x12c   :  { %v189_v32 = vmax.f32 %v171_v29, 0.0  ;;  %v2118_v33 = vpop.f32.mrb[2].mxu0  ;;  %v845_v29 = vld [vmem:[#allocation8 + $0x98] sm:$0xff] }
 0x12d   :  { %v186_v35 = vadd.f32 %v2118_v33, %v1854_v25  ;;  %v180_v36 = vpop.f32.mrb[3].mxu0  ;;  %v2391_v30 = vpack.c.bf16 %v845_v29, %v844_v28 }
 0x12e   :  { %v181_v38 = vadd.f32 %v1854_v25, %v180_v36  ;;  %2127 = vmatprep.mubr.msk.f32.mxu1 %vm91_vm0, %v189_v32  ;;  %v512_v25 = vld [vmem:[#allocation5 + $0xc8] sm:$0xff] }
 0x12f   :  { %2128 = vmatmul.mubr.msk.f32.vlgmr.msra.gmra.mrb[0].mxu1 %vm91_vm0, %v190_v34  ;;  %v192_v40 = vmax.f32 %v186_v35, 0.0 }
 0x130   :  { %v191_v39 = vmax.f32 %v181_v38, 0.0  ;;  %2366 = vmatpush3.bf16.msra.mxu1 %v2363_v24  ;;  %v2143_v41 = vpop.f32.mrb[4].mxu0  ;;  %v511_v24 = vld [vmem:[#allocation5 + $0xc0] sm:$0xff] }
 0x131   :  { %2368 = vmatprep.subr.bf16.mxu1 %v2367_v37  ;;  %v378_v42 = vpop.f32.mrb[5].mxu0 }
 0x132   :  { %2130 = vmatprep.mubr.msk.f32.mxu1 %vm91_vm0, %v191_v39  ;;  %v2371_v43 = vpack.c.bf16 %v2143_v41, %v378_v42 }
 0x133   :  { %2131 = vmatmul.mubr.msk.f32.gmra.mrb[2].mxu1 %vm91_vm0, %v192_v40 }
 0x134   :  { %2370 = vmatpush3.bf16.msra.mxu1 %v2367_v37  ;;  %2155 = vmatprep.mubr.msk.f32.mxu1 %vm91_vm0, %v2713_v5  ;;  %v2146_v44 = vpop.f32.mrb[6].mxu0 }
 0x135   :  { %2372 = vmatprep.subr.bf16.mxu0 %v2371_v43  ;;  %v388_v45 = vpop.f32.mrb[7].mxu0  ;;  %2388 = vmatprep.subr.bf16.mxu1 %v2387_v50 }
 0x136   :  { %2374 = vmatpush3.bf16.msra.mxu0 %v2371_v43  ;;  %v2375_v46 = vpack.c.bf16 %v2146_v44, %v388_v45 }
 0x137   :  { %2156 = vmatmul.mubr.msk.f32.vlgmr.msra.gmra.mrb[4].mxu1 %vm91_vm0, %v2717_v13 }
 0x138   :  { %2158 = vmatprep.mubr.msk.f32.mxu1 %vm91_vm0, %v2719_v14  ;;  %2376 = vmatprep.subr.bf16.mxu0 %v2375_v46 }
 0x139   :  { %2390 = vmatpush3.bf16.msra.mxu1 %v2387_v50 }
 0x13a   :  { %2378 = vmatpush3.bf16.msra.mxu0 %v2375_v46  ;;  %2392 = vmatprep.subr.bf16.mxu1 %v2391_v30 }
 0x13b   :  { %2159 = vmatmul.mubr.msk.f32.gmra.mrb[6].mxu1 %vm91_vm0, %v2725_v15 }
 0x13d   :  { %2394 = vmatpush3.bf16.msra.mxu1 %v2391_v30 }
 0x202   :  { %v2753_v51 = vpop.f32.mrb[0].mxu1 }
 0x203   :  { %v2755_v52 = vpop.f32.mrb[1].mxu1 }
 0x206   :  { %v2757_v53 = vpop.f32.mrb[2].mxu1 }
 0x207   :  { %v2759_v54 = vpop.f32.mrb[3].mxu1 }
 0x20a   :  { %v2157_v55 = vpop.f32.mrb[4].mxu1 }
 0x20b   :  { %v468_v56 = vpop.f32.mrb[5].mxu1 }
 0x20c   :  { %v2379_v57 = vpack.c.bf16 %v2157_v55, %v468_v56 }
 0x20e   :  { %v2160_v58 = vpop.f32.mrb[6].mxu1  ;;  %2380 = vmatprep.subr.bf16.mxu0 %v2379_v57 }
 0x20f   :  { %v478_v59 = vpop.f32.mrb[7].mxu1  ;;  %2382 = vmatpush3.bf16.msra.mxu0 %v2379_v57 }
 0x210   :  { %v2383_v60 = vpack.c.bf16 %v2160_v58, %v478_v59 }
 0x212   :  { %2384 = vmatprep.subr.bf16.mxu0 %v2383_v60 }
 0x213   :  { %2386 = vmatpush3.bf16.msra.mxu0 %v2383_v60 }
 0x216   :  { %2178 = vmatmul.mubr.msk.f32.vlgmr.msra.gmra.mrb[8].mxu0 %vm523_vm1, %v488_v61 }
 0x217   :  { %2180 = vmatprep.mubr.msk.f32.mxu0 %vm523_vm1, %v489_v62 }
 0x21a   :  { %2181 = vmatmul.mubr.msk.f32.gmra.mrb[10].mxu0 %vm523_vm1, %v490_v63 }
 0x21b   :  { %2183 = vmatprep.mubr.msk.f32.mxu0 %vm523_vm1, %v491_v0 }
 0x21e   :  { %2184 = vmatmul.mubr.msk.f32.gmra.mrb[12].mxu0 %vm523_vm1, %v492_v1 }
 0x21f   :  { %2186 = vmatprep.mubr.msk.f32.mxu0 %vm523_vm1, %v493_v2 }
 0x222   :  { %2187 = vmatmul.mubr.msk.f32.gmra.mrb[14].mxu0 %vm523_vm1, %v494_v3 }
 0x223   :  { %2189 = vmatprep.mubr.msk.f32.mxu0 %vm523_vm1, %v495_v4 }
 0x226   :  { %2190 = vmatmul.mubr.msk.f32.gmra.mrb[16].mxu0 %vm523_vm1, %v496_v6 }
 0x227   :  { %2192 = vmatprep.mubr.msk.f32.mxu0 %vm523_vm1, %v497_v7 }
 0x22a   :  { %2193 = vmatmul.mubr.msk.f32.gmra.mrb[18].mxu0 %vm523_vm1, %v498_v8 }
 0x22b   :  { %2195 = vmatprep.mubr.msk.f32.mxu0 %vm523_vm1, %v499_v9 }
 0x22e   :  { %2196 = vmatmul.mubr.msk.f32.gmra.mrb[20].mxu0 %vm523_vm1, %v500_v10 }
 0x22f   :  { %2198 = vmatprep.mubr.msk.f32.mxu0 %vm523_vm1, %v501_v11 }
 0x232   :  { %2199 = vmatmul.mubr.msk.f32.gmra.mrb[22].mxu0 %vm523_vm1, %v502_v12 }
 0x233   :  { %2201 = vmatprep.mubr.msk.f32.mxu0 %vm523_vm1, %v503_v16 }
 0x236   :  { %2202 = vmatmul.mubr.msk.f32.gmra.mrb[24].mxu0 %vm523_vm1, %v504_v17 }
 0x237   :  { %2204 = vmatprep.mubr.msk.f32.mxu0 %vm523_vm1, %v505_v18 }
 0x23a   :  { %2205 = vmatmul.mubr.msk.f32.gmra.mrb[26].mxu0 %vm523_vm1, %v506_v19 }
 0x23b   :  { %2207 = vmatprep.mubr.msk.f32.mxu0 %vm523_vm1, %v507_v20 }
 0x23e   :  { %2208 = vmatmul.mubr.msk.f32.gmra.mrb[28].mxu0 %vm523_vm1, %v508_v21 }
 0x23f   :  { %2210 = vmatprep.mubr.msk.f32.mxu0 %vm523_vm1, %v509_v22 }
 0x242   :  { %2211 = vmatmul.mubr.msk.f32.gmra.mrb[30].mxu0 %vm523_vm1, %v510_v23 }
 0x243   :  { %2213 = vmatprep.mubr.msk.f32.mxu0 %vm523_vm1, %v511_v24 }
 0x246   :  { %2214 = vmatmul.mubr.msk.f32.gmra.mrb[32].mxu0 %vm523_vm1, %v512_v25 }
 0x247   :  { %2216 = vmatprep.mubr.msk.f32.mxu0 %vm523_vm1, %v513_v26 }
 0x24a   :  { %2217 = vmatmul.mubr.msk.f32.gmra.mrb[34].mxu0 %vm523_vm1, %v514_v27 }
 0x2e9   :  { %v2179_v32 = vpop.f32.mrb[8].mxu0 }
 0x2ea   :  { %v680_v33 = vadd.f32 %v2179_v32, %v2791_v31  ;;  %v674_v34 = vpop.f32.mrb[9].mxu0 }
 0x2eb   :  { %v675_v35 = vadd.f32 %v2791_v31, %v674_v34 }
 0x2ec   :  { %v814_v38 = vmax.f32 %v680_v33, 0.0 }
 0x2ed   :  { %v813_v36 = vmax.f32 %v675_v35, 0.0  ;;  %v2182_v37 = vpop.f32.mrb[10].mxu0 }
 0x2ee   :  { %v690_v39 = vadd.f32 %v2182_v37, %v2791_v31  ;;  %v684_v40 = vpop.f32.mrb[11].mxu0 }
 0x2ef   :  { %v685_v41 = vadd.f32 %v2791_v31, %v684_v40  ;;  %2227 = vmatprep.mubr.msk.f32.mxu1 %vm91_vm0, %v813_v36 }
 0x2f0   :  { %2228 = vmatmul.mubr.msk.f32.vlgmr.msra.gmra.mrb[8].mxu1 %vm91_vm0, %v814_v38  ;;  %v816_v44 = vmax.f32 %v690_v39, 0.0 }
 0x2f1   :  { %v815_v42 = vmax.f32 %v685_v41, 0.0  ;;  %v2185_v43 = vpop.f32.mrb[12].mxu0 }
 0x2f2   :  { %v700_v45 = vadd.f32 %v2185_v43, %v2791_v31  ;;  %v694_v46 = vpop.f32.mrb[13].mxu0 }
 0x2f3   :  { %v695_v47 = vadd.f32 %v2791_v31, %v694_v46  ;;  %2230 = vmatprep.mubr.msk.f32.mxu1 %vm91_vm0, %v815_v42 }
 0x2f4   :  { %2231 = vmatmul.mubr.msk.f32.gmra.mrb[10].mxu1 %vm91_vm0, %v816_v44  ;;  %v818_v50 = vmax.f32 %v700_v45, 0.0 }
 0x2f5   :  { %v817_v48 = vmax.f32 %v695_v47, 0.0  ;;  %v2188_v49 = vpop.f32.mrb[14].mxu0 }
 0x2f6   :  { %v710_v55 = vadd.f32 %v2188_v49, %v2791_v31  ;;  %v704_v56 = vpop.f32.mrb[15].mxu0 }
 0x2f7   :  { %v705_v57 = vadd.f32 %v2791_v31, %v704_v56  ;;  %2233 = vmatprep.mubr.msk.f32.mxu1 %vm91_vm0, %v817_v48 }
 0x2f8   :  { %2234 = vmatmul.mubr.msk.f32.gmra.mrb[12].mxu1 %vm91_vm0, %v818_v50  ;;  %v820_v60 = vmax.f32 %v710_v55, 0.0 }
 0x2f9   :  { %v819_v58 = vmax.f32 %v705_v57, 0.0  ;;  %v2191_v59 = vpop.f32.mrb[16].mxu0 }
 0x2fa   :  { %v720_v61 = vadd.f32 %v2191_v59, %v2791_v31  ;;  %v714_v62 = vpop.f32.mrb[17].mxu0 }
 0x2fb   :  { %v715_v63 = vadd.f32 %v2791_v31, %v714_v62  ;;  %2236 = vmatprep.mubr.msk.f32.mxu1 %vm91_vm0, %v819_v58 }
 0x2fc   :  { %2237 = vmatmul.mubr.msk.f32.gmra.mrb[14].mxu1 %vm91_vm0, %v820_v60  ;;  %v822_v2 = vmax.f32 %v720_v61, 0.0 }
 0x2fd   :  { %v821_v0 = vmax.f32 %v715_v63, 0.0  ;;  %v2194_v1 = vpop.f32.mrb[18].mxu0 }
 0x2fe   :  { %v730_v3 = vadd.f32 %v2194_v1, %v2791_v31  ;;  %v724_v4 = vpop.f32.mrb[19].mxu0  ;;  %v2617_v1 = vmov 0.0|0.0  }
 0x2ff   :  { %v725_v6 = vadd.f32 %v2791_v31, %v724_v4  ;;  %2239 = vmatprep.mubr.msk.f32.mxu1 %vm91_vm0, %v821_v0  ;;  %2395 = vmatprep.subr.bf16.mxu1 %v2617_v1  ;;  %v1283_v4 = vld [vmem:[#allocation8 + $0xa8] sm:$0xff] }
 0x300   :  { %2240 = vmatmul.mubr.msk.f32.gmra.mrb[16].mxu1 %vm91_vm0, %v822_v2  ;;  %v824_v9 = vmax.f32 %v730_v3, 0.0  ;;  %v1172_v2 = vld [vmem:[#allocation7 + $0x8] sm:$0xff]  ;;  %v1282_v3 = vld [vmem:[#allocation8 + $0xa0] sm:$0xff] }
 0x301   :  { %v823_v7 = vmax.f32 %v725_v6, 0.0  ;;  %v2197_v8 = vpop.f32.mrb[20].mxu0  ;;  %v2437_v6 = vpack.c.bf16 %v1283_v4, %v1282_v3 }
 0x302   :  { %v740_v10 = vadd.f32 %v2197_v8, %v2791_v31  ;;  %v734_v11 = vpop.f32.mrb[21].mxu0 }
 0x303   :  { %v735_v12 = vadd.f32 %v2791_v31, %v734_v11  ;;  %2242 = vmatprep.mubr.msk.f32.mxu1 %vm91_vm0, %v823_v7  ;;  %v1285_v7 = vld [vmem:[#allocation8 + $0xb8] sm:$0xff]  ;;  %2438 = vmatprep.subr.bf16.mxu0 %v2437_v6 }
 0x304   :  { %2243 = vmatmul.mubr.msk.f32.gmra.mrb[18].mxu1 %vm91_vm0, %v824_v9  ;;  %v826_v18 = vmax.f32 %v740_v10, 0.0  ;;  %2440 = vmatpush3.bf16.msra.mxu0 %v2437_v6  ;;  %v2854_v9 = vld [vmem:[%s2966_s4 + $0x3] ss:$0 sm:$0xff] }
 0x305   :  { %v825_v16 = vmax.f32 %v735_v12, 0.0  ;;  %v2200_v17 = vpop.f32.mrb[22].mxu0 }
 0x306   :  { %v750_v19 = vadd.f32 %v2200_v17, %v2791_v31  ;;  %v744_v20 = vpop.f32.mrb[23].mxu0 }
 0x307   :  { %v745_v21 = vadd.f32 %v2791_v31, %v744_v20  ;;  %2245 = vmatprep.mubr.msk.f32.mxu1 %vm91_vm0, %v825_v16 }
 0x308   :  { %2246 = vmatmul.mubr.msk.f32.gmra.mrb[20].mxu1 %vm91_vm0, %v826_v18  ;;  %v828_v24 = vmax.f32 %v750_v19, 0.0 }
 0x309   :  { %v827_v22 = vmax.f32 %v745_v21, 0.0  ;;  %v2203_v23 = vpop.f32.mrb[24].mxu0 }
 0x30a   :  { %v760_v25 = vadd.f32 %v2203_v23, %v2791_v31  ;;  %v754_v26 = vpop.f32.mrb[25].mxu0 }
 0x30b   :  { %v755_v27 = vadd.f32 %v2791_v31, %v754_v26  ;;  %2248 = vmatprep.mubr.msk.f32.mxu1 %vm91_vm0, %v827_v22 }
 0x30c   :  { %2249 = vmatmul.mubr.msk.f32.gmra.mrb[22].mxu1 %vm91_vm0, %v828_v24  ;;  %v830_v30 = vmax.f32 %v760_v25, 0.0 }
 0x30d   :  { %v829_v28 = vmax.f32 %v755_v27, 0.0  ;;  %v2206_v29 = vpop.f32.mrb[26].mxu0 }
 0x30e   :  { %v770_v32 = vadd.f32 %v2206_v29, %v2791_v31  ;;  %v764_v33 = vpop.f32.mrb[27].mxu0 }
 0x30f   :  { %v765_v34 = vadd.f32 %v2791_v31, %v764_v33  ;;  %2251 = vmatprep.mubr.msk.f32.mxu1 %vm91_vm0, %v829_v28 }
 0x310   :  { %2252 = vmatmul.mubr.msk.f32.gmra.mrb[24].mxu1 %vm91_vm0, %v830_v30  ;;  %v832_v37 = vmax.f32 %v770_v32, 0.0 }
 0x311   :  { %v831_v35 = vmax.f32 %v765_v34, 0.0  ;;  %v2209_v36 = vpop.f32.mrb[28].mxu0 }
 0x312   :  { %v780_v38 = vadd.f32 %v2209_v36, %v2791_v31  ;;  %v774_v39 = vpop.f32.mrb[29].mxu0 }
 0x313   :  { %v775_v40 = vadd.f32 %v2791_v31, %v774_v39  ;;  %2254 = vmatprep.mubr.msk.f32.mxu1 %vm91_vm0, %v831_v35 }
 0x314   :  { %2255 = vmatmul.mubr.msk.f32.gmra.mrb[26].mxu1 %vm91_vm0, %v832_v37  ;;  %v834_v43 = vmax.f32 %v780_v38, 0.0 }
 0x315   :  { %v833_v41 = vmax.f32 %v775_v40, 0.0  ;;  %v2212_v42 = vpop.f32.mrb[30].mxu0 }
 0x316   :  { %v790_v44 = vadd.f32 %v2212_v42, %v2791_v31  ;;  %v784_v45 = vpop.f32.mrb[31].mxu0 }
 0x317   :  { %v785_v46 = vadd.f32 %v2791_v31, %v784_v45  ;;  %2257 = vmatprep.mubr.msk.f32.mxu1 %vm91_vm0, %v833_v41 }
 0x318   :  { %2258 = vmatmul.mubr.msk.f32.gmra.mrb[28].mxu1 %vm91_vm0, %v834_v43  ;;  %v836_v49 = vmax.f32 %v790_v44, 0.0 }
 0x319   :  { %v835_v47 = vmax.f32 %v785_v46, 0.0  ;;  %v2215_v48 = vpop.f32.mrb[32].mxu0 }
 0x31a   :  { %v800_v50 = vadd.f32 %v2215_v48, %v2791_v31  ;;  %v794_v55 = vpop.f32.mrb[33].mxu0 }
 0x31b   :  { %v795_v56 = vadd.f32 %v2791_v31, %v794_v55  ;;  %2260 = vmatprep.mubr.msk.f32.mxu1 %vm91_vm0, %v835_v47 }
 0x31c   :  { %2261 = vmatmul.mubr.msk.f32.gmra.mrb[30].mxu1 %vm91_vm0, %v836_v49  ;;  %v838_v59 = vmax.f32 %v800_v50, 0.0 }
 0x31d   :  { %v837_v57 = vmax.f32 %v795_v56, 0.0  ;;  %v2218_v58 = vpop.f32.mrb[34].mxu0 }
 0x31e   :  { %v810_v60 = vadd.f32 %v2218_v58, %v2791_v31  ;;  %v804_v61 = vpop.f32.mrb[35].mxu0 }
 0x31f   :  { %v805_v62 = vadd.f32 %v2791_v31, %v804_v61  ;;  %2263 = vmatprep.mubr.msk.f32.mxu1 %vm91_vm0, %v837_v57  ;;  %v1284_v31 = vld [vmem:[#allocation8 + $0xb0] sm:$0xff] }
 0x320   :  { %2264 = vmatmul.mubr.msk.f32.gmra.mrb[32].mxu1 %vm91_vm0, %v838_v59  ;;  %v840_v0 = vmax.f32 %v810_v60, 0.0  ;;  %v2441_v8 = vpack.c.bf16 %v1285_v7, %v1284_v31 }
 0x321   :  { %v839_v63 = vmax.f32 %v805_v62, 0.0 }
 0x322   :  { %2442 = vmatprep.subr.bf16.mxu0 %v2441_v8 }
 0x323   :  { %2266 = vmatprep.mubr.msk.f32.mxu1 %vm91_vm0, %v839_v63  ;;  %2444 = vmatpush3.bf16.msra.mxu0 %v2441_v8 }
 0x324   :  { %2267 = vmatmul.mubr.msk.f32.gmra.mrb[34].mxu1 %vm91_vm0, %v840_v0 }
 0x325   :  { %1933 = vmatprep.mubr.msk.f32.mxu1 %vm1179_vm2, %v1172_v2 }
 0x3c3   :  { %v2229_v10 = vpop.f32.mrb[8].mxu1 }
 0x3c4   :  { %v1010_v11 = vadd.f32 %v2229_v10, %v2854_v9  ;;  %v1004_v12 = vpop.f32.mrb[9].mxu1 }
 0x3c5   :  { %v1005_v16 = vadd.f32 %v2854_v9, %v1004_v12 }
 0x3c6   :  { %v1144_v17 = vmax.f32 %v1010_v11, 0.0 }
 0x3c7   :  { %v1143_v18 = vmax.f32 %v1005_v16, 0.0  ;;  %v2232_v19 = vpop.f32.mrb[10].mxu1 }
 0x3c8   :  { %v1020_v20 = vadd.f32 %v2232_v19, %v2854_v9  ;;  %v1014_v21 = vpop.f32.mrb[11].mxu1 }
 0x3c9   :  { %v2396_v22 = vpack.c.bf16 %v1144_v17, %v1143_v18  ;;  %v1015_v23 = vadd.f32 %v2854_v9, %v1014_v21 }
 0x3ca   :  { %v1146_v24 = vmax.f32 %v1020_v20, 0.0 }
 0x3cb   :  { %v1145_v25 = vmax.f32 %v1015_v23, 0.0  ;;  %v2235_v26 = vpop.f32.mrb[12].mxu1  ;;  %2397 = vmatpush1.bf16.msra.mxu1 %v2396_v22 }
 0x3cc   :  { %v1030_v27 = vadd.f32 %v2235_v26, %v2854_v9  ;;  %v1024_v28 = vpop.f32.mrb[13].mxu1  ;;  %2398 = vmatprep.subr.bf16.mxu1 %v2617_v1 }
 0x3cd   :  { %v2399_v29 = vpack.c.bf16 %v1146_v24, %v1145_v25  ;;  %v1025_v30 = vadd.f32 %v2854_v9, %v1024_v28 }
 0x3ce   :  { %v1148_v32 = vmax.f32 %v1030_v27, 0.0 }
 0x3cf   :  { %v1147_v33 = vmax.f32 %v1025_v30, 0.0  ;;  %v2238_v34 = vpop.f32.mrb[14].mxu1  ;;  %2400 = vmatpush1.bf16.msra.mxu1 %v2399_v29 }
 0x3d0   :  { %v1040_v35 = vadd.f32 %v2238_v34, %v2854_v9  ;;  %v1034_v36 = vpop.f32.mrb[15].mxu1  ;;  %2401 = vmatprep.subr.bf16.mxu1 %v2617_v1 }
 0x3d1   :  { %v2402_v37 = vpack.c.bf16 %v1148_v32, %v1147_v33  ;;  %v1035_v38 = vadd.f32 %v2854_v9, %v1034_v36 }
 0x3d2   :  { %v1150_v39 = vmax.f32 %v1040_v35, 0.0 }
 0x3d3   :  { %v1149_v40 = vmax.f32 %v1035_v38, 0.0  ;;  %v2241_v41 = vpop.f32.mrb[16].mxu1  ;;  %2403 = vmatpush1.bf16.msra.mxu1 %v2402_v37 }
 0x3d4   :  { %v1050_v42 = vadd.f32 %v2241_v41, %v2854_v9  ;;  %v1044_v43 = vpop.f32.mrb[17].mxu1  ;;  %2404 = vmatprep.subr.bf16.mxu1 %v2617_v1 }
 0x3d5   :  { %v2405_v44 = vpack.c.bf16 %v1150_v39, %v1149_v40  ;;  %v1045_v45 = vadd.f32 %v2854_v9, %v1044_v43 }
 0x3d6   :  { %v1152_v46 = vmax.f32 %v1050_v42, 0.0 }
 0x3d7   :  { %v1151_v47 = vmax.f32 %v1045_v45, 0.0  ;;  %v2244_v48 = vpop.f32.mrb[18].mxu1  ;;  %2406 = vmatpush1.bf16.msra.mxu1 %v2405_v44 }
 0x3d8   :  { %v1060_v49 = vadd.f32 %v2244_v48, %v2854_v9  ;;  %v1054_v50 = vpop.f32.mrb[19].mxu1  ;;  %2407 = vmatprep.subr.bf16.mxu1 %v2617_v1 }
 0x3d9   :  { %v2408_v55 = vpack.c.bf16 %v1152_v46, %v1151_v47  ;;  %v1055_v56 = vadd.f32 %v2854_v9, %v1054_v50 }
 0x3da   :  { %v1154_v57 = vmax.f32 %v1060_v49, 0.0 }
 0x3db   :  { %v1153_v58 = vmax.f32 %v1055_v56, 0.0  ;;  %v2247_v59 = vpop.f32.mrb[20].mxu1  ;;  %2409 = vmatpush1.bf16.msra.mxu1 %v2408_v55 }
 0x3dc   :  { %v1070_v60 = vadd.f32 %v2247_v59, %v2854_v9  ;;  %v1064_v61 = vpop.f32.mrb[21].mxu1  ;;  %2410 = vmatprep.subr.bf16.mxu1 %v2617_v1 }
 0x3dd   :  { %v2411_v62 = vpack.c.bf16 %v1154_v57, %v1153_v58  ;;  %v1065_v63 = vadd.f32 %v2854_v9, %v1064_v61 }
 0x3de   :  { %v1156_v0 = vmax.f32 %v1070_v60, 0.0 }
 0x3df   :  { %v1155_v2 = vmax.f32 %v1065_v63, 0.0  ;;  %v2250_v3 = vpop.f32.mrb[22].mxu1  ;;  %2412 = vmatpush1.bf16.msra.mxu1 %v2411_v62  ;;  %v1171_v62 = vld [vmem:[#allocation7] sm:$0xff]  ;;  %v1174_v63 = vld [vmem:[#allocation7 + $0x18] sm:$0xff] }
 0x3e0   :  { %v1080_v4 = vadd.f32 %v2250_v3, %v2854_v9  ;;  %v1074_v31 = vpop.f32.mrb[23].mxu1  ;;  %2413 = vmatprep.subr.bf16.mxu1 %v2617_v1  ;;  %v1175_v3 = vld [vmem:[#allocation7 + $0x20] sm:$0xff] }
 0x3e1   :  { %v2414_v6 = vpack.c.bf16 %v1156_v0, %v1155_v2  ;;  %v1075_v7 = vadd.f32 %v2854_v9, %v1074_v31  ;;  %v1173_v0 = vld [vmem:[#allocation7 + $0x10] sm:$0xff]  ;;  %v1176_v2 = vld [vmem:[#allocation7 + $0x28] sm:$0xff] }
 0x3e2   :  { %v1158_v8 = vmax.f32 %v1080_v4, 0.0  ;;  %v1178_v4 = vld [vmem:[#allocation7 + $0x38] sm:$0xff]  ;;  %v1397_v31 = vld [vmem:[#allocation8 + $0xc8] sm:$0xff] }
 0x3e3   :  { %v1157_v10 = vmax.f32 %v1075_v7, 0.0  ;;  %v2253_v11 = vpop.f32.mrb[24].mxu1  ;;  %2415 = vmatpush1.bf16.msra.mxu1 %v2414_v6  ;;  %v1860_v7 = vld [vmem:[%s2966_s4 + $0x1] ss:$0 sm:$0xff] }
 0x3e4   :  { %v1090_v12 = vadd.f32 %v2253_v11, %v2854_v9  ;;  %v1084_v16 = vpop.f32.mrb[25].mxu1  ;;  %2416 = vmatprep.subr.bf16.mxu1 %v2617_v1 }
 0x3e5   :  { %v2417_v17 = vpack.c.bf16 %v1158_v8, %v1157_v10  ;;  %v1085_v18 = vadd.f32 %v2854_v9, %v1084_v16  ;;  %v285_v8 = vadd.f32 %v1860_v7, %v2755_v52  ;;  %v290_v10 = vadd.f32 %v2753_v51, %v1860_v7 }
 0x3e6   :  { %v1160_v19 = vmax.f32 %v1090_v12, 0.0 }
 0x3e7   :  { %v1159_v20 = vmax.f32 %v1085_v18, 0.0  ;;  %v2256_v21 = vpop.f32.mrb[26].mxu1  ;;  %2418 = vmatpush1.bf16.msra.mxu1 %v2417_v17  ;;  %v303_v11 = vmax.f32 %v285_v8, 0.0  ;;  %v304_v18 = vmax.f32 %v290_v10, 0.0  ;;  %v1720_v8 = vld [vmem:[#allocation8 + $0x130] sm:$0xff]  ;;  %v1721_v10 = vld [vmem:[#allocation8 + $0x138] sm:$0xff] }
 0x3e8   :  { %v1100_v22 = vadd.f32 %v2256_v21, %v2854_v9  ;;  %v1094_v23 = vpop.f32.mrb[27].mxu1  ;;  %2419 = vmatprep.subr.bf16.mxu1 %v2617_v1 }
 0x3e9   :  { %v2420_v24 = vpack.c.bf16 %v1160_v19, %v1159_v20  ;;  %v1095_v25 = vadd.f32 %v2854_v9, %v1094_v23  ;;  %v295_v19 = vadd.f32 %v1860_v7, %v2759_v54 }
 0x3ea   :  { %v1162_v26 = vmax.f32 %v1100_v22, 0.0  ;;  %v300_v22 = vadd.f32 %v2757_v53, %v1860_v7  ;;  %v1515_v53 = vld [vmem:[#allocation8 + $0x100] sm:$0xff] }
 0x3eb   :  { %v1161_v27 = vmax.f32 %v1095_v25, 0.0  ;;  %v2259_v28 = vpop.f32.mrb[28].mxu1  ;;  %2421 = vmatpush1.bf16.msra.mxu1 %v2420_v24  ;;  %v305_v23 = vmax.f32 %v295_v19, 0.0 }
 0x3ec   :  { %v1110_v29 = vadd.f32 %v2259_v28, %v2854_v9  ;;  %v1104_v30 = vpop.f32.mrb[29].mxu1  ;;  %2422 = vmatprep.subr.bf16.mxu1 %v2617_v1  ;;  %v306_v25 = vmax.f32 %v300_v22, 0.0  ;;  %v1398_v28 = vld [vmem:[#allocation8 + $0xd0] sm:$0xff] }
 0x3ed   :  { %v2423_v32 = vpack.c.bf16 %v1162_v26, %v1161_v27  ;;  %v1105_v33 = vadd.f32 %v2854_v9, %v1104_v30 }
 0x3ee   :  { %v1164_v34 = vmax.f32 %v1110_v29, 0.0  ;;  %v1399_v29 = vld [vmem:[#allocation8 + $0xd8] sm:$0xff] }
 0x3ef   :  { %v1163_v35 = vmax.f32 %v1105_v33, 0.0  ;;  %v2262_v36 = vpop.f32.mrb[30].mxu1  ;;  %2424 = vmatpush1.bf16.msra.mxu1 %v2423_v32  ;;  %v2449_v30 = vpack.c.bf16 %v1399_v29, %v1398_v28  ;;  %v1516_v32 = vld [vmem:[#allocation8 + $0x108] sm:$0xff]  ;;  %v1517_v33 = vld [vmem:[#allocation8 + $0x110] sm:$0xff] }
 0x3f0   :  { %v1120_v37 = vadd.f32 %v2262_v36, %v2854_v9  ;;  %v1114_v38 = vpop.f32.mrb[31].mxu1  ;;  %2425 = vmatprep.subr.bf16.mxu1 %v2617_v1 }
 0x3f1   :  { %v2426_v39 = vpack.c.bf16 %v1164_v34, %v1163_v35  ;;  %v1115_v40 = vadd.f32 %v2854_v9, %v1114_v38  ;;  %v2453_v34 = vpack.c.bf16 %v1516_v32, %v1515_v53  ;;  %v1518_v35 = vld [vmem:[#allocation8 + $0x118] sm:$0xff]  ;;  %v1511_v38 = vld [vmem:[#allocation8 + $0xe8] sm:$0xff] }
 0x3f2   :  { %v1166_v41 = vmax.f32 %v1120_v37, 0.0  ;;  %v2457_v36 = vpack.c.bf16 %v1518_v35, %v1517_v33  ;;  %v1510_v37 = vld [vmem:[#allocation8 + $0xe0] sm:$0xff] }
 0x3f3   :  { %v1165_v42 = vmax.f32 %v1115_v40, 0.0  ;;  %v2265_v43 = vpop.f32.mrb[32].mxu1  ;;  %2427 = vmatpush1.bf16.msra.mxu1 %v2426_v39  ;;  %v2461_v39 = vpack.c.bf16 %v1511_v38, %v1510_v37  ;;  %v1938_v40 = vld [vmem:[%s2966_s4 + $0x4] ss:$0 sm:$0xff] }
 0x3f4   :  { %v1130_v44 = vadd.f32 %v2265_v43, %v2854_v9  ;;  %v1124_v45 = vpop.f32.mrb[33].mxu1  ;;  %2428 = vmatprep.subr.bf16.mxu1 %v2617_v1 }
 0x3f5   :  { %v2429_v46 = vpack.c.bf16 %v1166_v41, %v1165_v42  ;;  %v1125_v47 = vadd.f32 %v2854_v9, %v1124_v45 }
 0x3f6   :  { %v1168_v48 = vmax.f32 %v1130_v44, 0.0 }
 0x3f7   :  { %v1167_v49 = vmax.f32 %v1125_v47, 0.0  ;;  %v2268_v50 = vpop.f32.mrb[34].mxu1  ;;  %2430 = vmatpush1.bf16.msra.mxu1 %v2429_v46 }
 0x3f8   :  { %v1140_v55 = vadd.f32 %v2268_v50, %v2854_v9  ;;  %v1134_v56 = vpop.f32.mrb[35].mxu1  ;;  %2431 = vmatprep.subr.bf16.mxu1 %v2617_v1  ;;  %v1512_v50 = vld [vmem:[#allocation8 + $0xf0] sm:$0xff] }
 0x3f9   :  { %v2432_v57 = vpack.c.bf16 %v1168_v48, %v1167_v49  ;;  %v1135_v58 = vadd.f32 %v2854_v9, %v1134_v56  ;;  %v1177_v9 = vld [vmem:[#allocation7 + $0x30] sm:$0xff] }
 0x3fa   :  { %v1170_v59 = vmax.f32 %v1140_v55, 0.0  ;;  %v1513_v55 = vld [vmem:[#allocation8 + $0xf8] sm:$0xff] }
 0x3fb   :  { %v1169_v60 = vmax.f32 %v1135_v58, 0.0  ;;  %2433 = vmatpush1.bf16.msra.mxu1 %v2432_v57  ;;  %v2465_v56 = vpack.c.bf16 %v1513_v55, %v1512_v50  ;;  %v1718_v57 = vld [vmem:[#allocation8 + $0x120] sm:$0xff]  ;;  %v1719_v58 = vld [vmem:[#allocation8 + $0x128] sm:$0xff] }
 0x3fc   :  { %2434 = vmatprep.subr.bf16.mxu1 %v2617_v1  ;;  %v1396_v1 = vld [vmem:[#allocation8 + $0xc0] sm:$0xff] }
 0x3fd   :  { %v2435_v61 = vpack.c.bf16 %v1170_v59, %v1169_v60  ;;  %v2445_v6 = vpack.c.bf16 %v1397_v31, %v1396_v1  ;;  %v2469_v59 = vpack.c.bf16 %v1719_v58, %v1718_v57  ;;  %v1944_v60 = vld [vmem:[%s2966_s4 + $0x5] ss:$0 sm:$0xff] }
 0x3ff   :  { %2436 = vmatpush1.bf16.msra.mxu1 %v2435_v61  ;;  %2446 = vmatprep.subr.bf16.mxu0 %v2445_v6 }
 0x400   :  { %2454 = vmatprep.subr.bf16.mxu1 %v2453_v34 }
 0x402   :  { %1257 = vmatmul.mubr.f32.vlgmr.msra.gmra.mrb[36].mxu1 %v1171_v62 }
 0x403   :  { %1934 = vmatprep.mubr.msk.f32.mxu1 %vm1179_vm2, %v1174_v63  ;;  %2456 = vmatpush3.bf16.msra.mxu1 %v2453_v34 }
 0x404   :  { %2458 = vmatprep.subr.bf16.mxu1 %v2457_v36 }
 0x406   :  { %1262 = vmatmul.mubr.f32.gmra.mrb[38].mxu1 %v1173_v0 }
 0x407   :  { %1935 = vmatprep.mubr.msk.f32.mxu1 %vm1179_vm2, %v1176_v2  ;;  %2460 = vmatpush3.bf16.msra.mxu1 %v2457_v36 }
 0x408   :  { %2462 = vmatprep.subr.bf16.mxu1 %v2461_v39 }
 0x40a   :  { %1267 = vmatmul.mubr.f32.gmra.mrb[40].mxu1 %v1175_v3 }
 0x40b   :  { %1936 = vmatprep.mubr.msk.f32.mxu1 %vm1179_vm2, %v1178_v4 }
 0x40e   :  { %1272 = vmatmul.mubr.f32.gmra.mrb[42].mxu1 %v1177_v9 }
 0x40f   :  { %2305 = vmatprep.mubr.msk.f32.mxu1 %vm91_vm0, %v2713_v5 }
 0x412   :  { %2306 = vmatmul.mubr.msk.f32.vlgmr.msra.gmra.mrb[44].mxu1 %vm91_vm0, %v2717_v13 }
 0x413   :  { %2464 = vmatpush3.bf16.msra.mxu1 %v2461_v39  ;;  %2308 = vmatprep.mubr.msk.f32.mxu1 %vm91_vm0, %v2719_v14 }
 0x414   :  { %2466 = vmatprep.subr.bf16.mxu1 %v2465_v56 }
 0x416   :  { %2309 = vmatmul.mubr.msk.f32.gmra.mrb[46].mxu1 %vm91_vm0, %v2725_v15 }
 0x417   :  { %2468 = vmatpush3.bf16.msra.mxu1 %v2465_v56 }
 0x4d5   :  { %v1258_v12 = vpop.f32.mrb[36].mxu1 }
 0x4d6   :  { %v1277_v16 = vadd.f32 %v1258_v12, %v303_v11  ;;  %v1260_v17 = vpop.f32.mrb[37].mxu1  ;;  %v2473_v11 = vpack.c.bf16 %v1721_v10, %v1720_v8  ;;  %v1958_v12 = vld [vmem:[%s2966_s4 + $0x6] ss:$0 sm:$0xff] }
 0x4d8   :  { %2277 = vmatprep.mubr.msk.f32.mxu0 %vm91_vm0, %v1277_v16 }
 0x4d9   :  { %v1263_v5 = vpop.f32.mrb[38].mxu1 }
 0x4da   :  { %v1278_v20 = vadd.f32 %v1263_v5, %v304_v18  ;;  %v1265_v21 = vpop.f32.mrb[39].mxu1 }
 0x4dc   :  { %2278 = vmatmul.mubr.msk.f32.vlgmr.msra.gmra.mrb[36].mxu0 %vm91_vm0, %v1278_v20 }
 0x4dd   :  { %v1268_v52 = vpop.f32.mrb[40].mxu1  ;;  %2448 = vmatpush3.bf16.msra.mxu0 %v2445_v6 }
 0x4de   :  { %v1279_v51 = vadd.f32 %v1268_v52, %v305_v23  ;;  %v1270_v24 = vpop.f32.mrb[41].mxu1  ;;  %2450 = vmatprep.subr.bf16.mxu0 %v2449_v30 }
 0x4e0   :  { %2280 = vmatprep.mubr.msk.f32.mxu0 %vm91_vm0, %v1279_v51 }
 0x4e1   :  { %v1273_v26 = vpop.f32.mrb[42].mxu1  ;;  %2452 = vmatpush3.bf16.msra.mxu0 %v2449_v30 }
 0x4e2   :  { %v1280_v27 = vadd.f32 %v1273_v26, %v306_v25  ;;  %v1275_v54 = vpop.f32.mrb[43].mxu1  ;;  %2470 = vmatprep.subr.bf16.mxu0 %v2469_v59  ;;  %v1960_v25 = vld [vmem:[%s2966_s4 + $0x7] ss:$0 sm:$0xff]  ;;  %s2579_s4 = scalar_lea.vmem %s1841_s10, 512 }
 0x4e3   :  { %p2580_p4 = scmp.ne.s32.totalorder %s1841_s10, %s2579_s4  ;;  %p2585_p6 = scmp.lt.s32.totalorder %s2579_s4, %s2579_s4 }
 0x4e4   :  { %2281 = vmatmul.mubr.msk.f32.gmra.mrb[38].mxu0 %vm91_vm0, %v1280_v27 }
 0x4e5   :  { %p2586_p7 = por %p2585_p6, %p2584_p5 }
 0x4e7   :  { %p2587_p8 = pnand %p2586_p7, %p2580_p4 }
 0x5af   :  { %v2279_v41 = vpop.f32.mrb[36].mxu0 }
 0x5b0   :  { %v1378_v42 = vadd.f32 %v2279_v41, %v1938_v40  ;;  %v1372_v43 = vpop.f32.mrb[37].mxu0 }
 0x5b1   :  { %v1373_v44 = vadd.f32 %v1938_v40, %v1372_v43 }
 0x5b2   :  { %v1392_v46 = vmax.f32 %v1378_v42, 0.0 }
 0x5b3   :  { %v1391_v45 = vmax.f32 %v1373_v44, 0.0 }
 0x5b5   :  { %2291 = vmatprep.mubr.msk.f32.mxu0 %vm91_vm0, %v1391_v45 }
 0x5b6   :  { %2292 = vmatmul.mubr.msk.f32.vlgmr.msra.gmra.mrb[40].mxu0 %vm91_vm0, %v1392_v46 }
 0x5b7   :  { %v2282_v13 = vpop.f32.mrb[38].mxu0  ;;  %2472 = vmatpush3.bf16.msra.mxu0 %v2469_v59 }
 0x5b8   :  { %v1388_v47 = vadd.f32 %v2282_v13, %v1938_v40  ;;  %v1382_v14 = vpop.f32.mrb[39].mxu0  ;;  %2474 = vmatprep.subr.bf16.mxu0 %v2473_v11 }
 0x5b9   :  { %v1383_v48 = vadd.f32 %v1938_v40, %v1382_v14 }
 0x5ba   :  { %v1394_v15 = vmax.f32 %v1388_v47, 0.0 }
 0x5bb   :  { %v1393_v49 = vmax.f32 %v1383_v48, 0.0  ;;  %2476 = vmatpush3.bf16.msra.mxu0 %v2473_v11 }
 0x5bd   :  { %2294 = vmatprep.mubr.msk.f32.mxu0 %vm91_vm0, %v1393_v49 }
 0x5be   :  { %2295 = vmatmul.mubr.msk.f32.gmra.mrb[42].mxu0 %vm91_vm0, %v1394_v15 }
 0x689   :  { %v2293_v61 = vpop.f32.mrb[40].mxu0 }
 0x68a   :  { %v1492_v62 = vadd.f32 %v2293_v61, %v1944_v60  ;;  %v1486_v63 = vpop.f32.mrb[41].mxu0 }
 0x68b   :  { %v1487_v0 = vadd.f32 %v1944_v60, %v1486_v63 }
 0x68c   :  { %v1506_v3 = vmax.f32 %v1492_v62, 0.0 }
 0x68d   :  { %v1505_v2 = vmax.f32 %v1487_v0, 0.0 }
 0x68f   :  { %2319 = vmatprep.mubr.msk.f32.mxu1 %vm91_vm0, %v1505_v2 }
 0x690   :  { %2320 = vmatmul.mubr.msk.f32.vlgmr.msra.gmra.mrb[44].mxu1 %vm91_vm0, %v1506_v3 }
 0x691   :  { %v2296_v4 = vpop.f32.mrb[42].mxu0 }
 0x692   :  { %v1502_v9 = vadd.f32 %v2296_v4, %v1944_v60  ;;  %v1496_v1 = vpop.f32.mrb[43].mxu0 }
 0x693   :  { %v1497_v31 = vadd.f32 %v1944_v60, %v1496_v1 }
 0x694   :  { %v1508_v7 = vmax.f32 %v1502_v9, 0.0 }
 0x695   :  { %v1507_v6 = vmax.f32 %v1497_v31, 0.0 }
 0x697   :  { %2322 = vmatprep.mubr.msk.f32.mxu1 %vm91_vm0, %v1507_v6 }
 0x698   :  { %2323 = vmatmul.mubr.msk.f32.gmra.mrb[46].mxu1 %vm91_vm0, %v1508_v7 }
 0x763   :  { %v2321_v16 = vpop.f32.mrb[44].mxu1 }
 0x764   :  { %v1710_v17 = vadd.f32 %v2321_v16, %v1958_v12  ;;  %v1682_v18 = vpop.f32.mrb[45].mxu1 }
 0x765   :  { %v1709_v19 = vadd.f32 %v1958_v12, %v1682_v18 }
 0x766   :  { %v1714_v20 = vmax.f32 %v1710_v17, 0.0 }
 0x767   :  { %v1713_v5 = vmax.f32 %v1709_v19, 0.0 }
 0x769   :  { %2333 = vmatprep.mubr.msk.f32.mxu0 %vm91_vm0, %v1713_v5 }
 0x76a   :  { %2334 = vmatmul.mubr.msk.f32.vlgmr.msra.gmra.mrb[44].mxu0 %vm91_vm0, %v1714_v20 }
 0x76b   :  { %v2324_v21 = vpop.f32.mrb[46].mxu1 }
 0x76c   :  { %v1712_v22 = vadd.f32 %v2324_v21, %v1958_v12  ;;  %v1692_v23 = vpop.f32.mrb[47].mxu1 }
 0x76d   :  { %v1711_v52 = vadd.f32 %v1958_v12, %v1692_v23 }
 0x76e   :  { %v1716_v24 = vmax.f32 %v1712_v22, 0.0 }
 0x76f   :  { %v1715_v51 = vmax.f32 %v1711_v52, 0.0 }
 0x771   :  { %2336 = vmatprep.mubr.msk.f32.mxu0 %vm91_vm0, %v1715_v51 }
 0x772   :  { %2337 = vmatmul.mubr.msk.f32.gmra.mrb[46].mxu0 %vm91_vm0, %v1716_v24 }
 0x83d   :  { %v2335_v26 = vpop.f32.mrb[44].mxu0 }
 0x83e   :  { %v1814_v27 = vadd.f32 %v2335_v26, %v1960_v25  ;;  %v1808_v54 = vpop.f32.mrb[45].mxu0 }
 0x83f   :  { %v1809_v28 = vadd.f32 %v1960_v25, %v1808_v54 }
 0x840   :  { %v1828_v29 = vmax.f32 %v1814_v27, 0.0 }
 0x841   :  { %v1827_v30 = vmax.f32 %v1809_v28, 0.0 }
 0x842   :  { %1832 = vst.msk [vmem:[#allocation10 + $0x8] sm:$0xff] %vm91_vm0, %v1828_v29 }
 0x843   :  { %1831 = vst.msk [vmem:[#allocation10] sm:$0xff] %vm91_vm0, %v1827_v30 }
 0x845   :  { %v2338_v53 = vpop.f32.mrb[46].mxu0 }
 0x846   :  { %v1824_v32 = vadd.f32 %v2338_v53, %v1960_v25  ;;  %v1818_v33 = vpop.f32.mrb[47].mxu0 }
 0x847   :  { %v1819_v34 = vadd.f32 %v1960_v25, %v1818_v33 }
 0x848   :  { %v1830_v35 = vmax.f32 %v1824_v32, 0.0 }
 0x849   :  { %v1829_v36 = vmax.f32 %v1819_v34, 0.0 }
 0x84a   :  { %1834 = vst.msk [vmem:[#allocation10 + $0x18] sm:$0xff] %vm91_vm0, %v1830_v35 }
 0x84b   :  { %1833 = vst.msk [vmem:[#allocation10 + $0x10] sm:$0xff] %vm91_vm0, %v1829_v36 }
 0x84c   :  { %2590 = shalt.err (!%p2587_p8)
}
 0x84d   :  { %s2591_s13 = scalar_lea.hbm %s2967_s5, 512 }
 0x84e   :  { %p2592_p9 = scmp.ne.s32.totalorder %s2967_s5, %s2591_s13  ;;  %p2595_p10 = scmp.lt.u32.totalorder %s2591_s13, %s2967_s5 }
 0x850   :  { %p2597_p11 = pnand %p2595_p10, %p2592_p9 }
 0x852   :  { %2600 = shalt.err (!%p2597_p11)
}
 0x853   :  { %1846 = dma.vmem_to_hbm [thread:$0]  %s1841_s10, 512, %s2967_s5, [#allocation4], %s2611_s30, %s2611_s30, %s2612_s6  }
 0x854   :  { %2607 = dma.done.wait [#allocation4], 512  }
 0x855   :  { %2608 = vsyncadd [#allocation4], 4294966784 }
 0x856   :  { %1850 = vsyncpa [#allocation3], 1 }
 0x857   :  { %1851 = vsyncpa [#allocation6], 1 }
 0x858   :  { %1852 = vsyncpa [#allocation9], 1 }
 0x859   :  { %1853 = vsyncpa [#allocation4], 1 }

</bundles_post_ra>
